<compile_context>
chip_gen: v7x
topology: tpu7x:2x2x1
jax: 0.10.0
libtpu: 0.0.40
codegen_flags: <defaults>
</compile_context>

<pallas_src>
import jax
import jax.numpy as jnp
from jax.experimental import pallas as pl
from jax.experimental.pallas import tpu as pltpu

NUM_CLASS = 18
FILTER_BG_THRESH = 0.1
BN_EPS = 1e-4          # reference: norm_fn = BatchNorm1d(eps=0.0001)
NUM_SPLITS = 2         # leading "parallel" grid axis: 2 TCs on v7x, serial elsewhere


def _round_up(x, m):
    return (x + m - 1) // m * m


def _tpu_defaults():
    """(tile_n, vmem_limit_bytes) per TPU generation."""
    try:
        kind = jax.devices()[0].device_kind.lower()
    except Exception:
        kind = ""
    if ("v5" in kind) or ("v6" in kind):
        # 128 MiB physical VMEM -> larger tiles amortize per-grid-step overhead.
        return 2048, 96 * 1024 * 1024
    # v7x (64 MiB physical VMEM) and unknown chips: conservative.
    return 1024, 48 * 1024 * 1024


# --------------------------------------------------------------------------
# Fused kernel: semantic MLP + softmax + one-hot scatter-sum over superpoints
# --------------------------------------------------------------------------
def _ia_pass1_kernel(x_ref, w1_ref, b1_ref, w2_ref, b2_ref, spps_ref,
                     sem_ref, psum_ref):
    """x_ref    : [TILE_N, C]   bf16 voxel features
       w1,b1    : Linear(C, C)  (eval-BatchNorm folded in), bf16 / f32
       w2,b2    : Linear(C, K_pad), bf16 / f32; columns >= K carry a -1e30
                  bias so their softmax probability is exactly 0.
       spps_ref : [1, TILE_N]   int32 superpoint id per voxel (padding rows
                  carry an out-of-range id so they contribute nothing)
       sem_ref  : [TILE_N, K]   softmax(semantic_scores) (per-tile output)
       psum_ref : [S_pad, K_pad] f32 per-split scatter-sum (resident output;
                  column K holds the exact per-superpoint voxel count)
    """
    i = pl.program_id(1)

    @pl.when(i == 0)
    def _init():
        psum_ref[...] = jnp.zeros_like(psum_ref)

    k = sem_ref.shape[1]            # real class count (num_class + 2)
    s_pad, k_pad = psum_ref.shape

    # --- semantic_linear: BatchNorm already folded into (w1, b1) ------------
    x = x_ref[...]                                                   # [T, C] bf16
    h = jnp.dot(x, w1_ref[...], preferred_element_type=jnp.float32) + b1_ref[...]
    h = jnp.maximum(h, 0.0)
    logits = jnp.dot(h.astype(jnp.bfloat16), w2_ref[...],
                     preferred_element_type=jnp.float32) + b2_ref[...]  # [T, K_pad]

    # --- softmax over classes (dim=1), f32; padded columns are exactly 0 ----
    m = jnp.max(logits, axis=-1, keepdims=True)
    e = jnp.exp(logits - m)
    denom = jnp.sum(e, axis=-1, keepdims=True)
    sm = e * pl.reciprocal(denom, approx=True)                       # [T, K_pad]
    sem_ref[...] = sm[:, :k]

    # --- scatter-sum over superpoints: one-hot @ softmax on the MXU ---------
    # Column K is forced to exactly 1.0 so the same matmul accumulates the
    # exact (integer-valued, f32-accumulated) per-superpoint voxel count.
    col_ids = jax.lax.broadcasted_iota(jnp.int32, (1, k_pad), 1)     # [1, K_pad]
    sm_aug = jnp.where(col_ids == k, 1.0, sm).astype(jnp.bfloat16)   # [T, K_pad]

    # Broadcast-compare one-hot: no [S_pad, TILE_N] int32 iota is materialized.
    iota_s = jax.lax.broadcasted_iota(jnp.int32, (s_pad, 1), 0)      # [S_pad, 1]
    onehot = (iota_s == spps_ref[...]).astype(jnp.bfloat16)          # [S_pad, T]

    psum_ref[...] += jnp.dot(onehot, sm_aug,
                             preferred_element_type=jnp.float32)     # [S_pad, K_pad]


# --------------------------------------------------------------------------
# Wrapper
# --------------------------------------------------------------------------
def ia_aware_pallas(voxel_feat, voxel_spps, num_spp, params, tile_n=None):
    """Fused IA_aware hot path.

    Returns (sem_softmax [N,K] f32, spp_sm [S,K] f32,
             spp_object_conditions [S] bool, object_conditions [N] bool).
    """
    N, C = voxel_feat.shape
    K = NUM_CLASS + 2
    K_pad = _round_up(K + 1, 8)                  # +1 exact-count column -> 24
    S = int(num_spp)
    S_pad = max(_round_up(S, 8), 8)              # sublane-aligned superpoints

    default_tile, vmem_limit = _tpu_defaults()
    if tile_n is None:
        tile_n = default_tile
    TILE_N = _round_up(min(int(tile_n), _round_up(N, 128)), 128)
    N_pad = _round_up(N, NUM_SPLITS * TILE_N)
    n_tiles = N_pad // TILE_N
    half = n_tiles // NUM_SPLITS                 # voxel tiles per core split

    w1, b1, bn_gamma, bn_beta, bn_mean, bn_var, w2, b2 = params
    # Fold eval-mode BatchNorm1d into the first Linear:
    #   BN(x@w1 + b1) = (x@w1 + b1)*s + t,  s = g/sqrt(var+eps), t = beta - mean*s
    #   => x @ (w1*s) + (b1*s + t)
    s = bn_gamma / jnp.sqrt(bn_var + BN_EPS)
    t = bn_beta - bn_mean * s
    w1f = (w1 * s[None, :]).astype(jnp.bfloat16)
    b1f = (b1 * s + t).reshape(1, C).astype(jnp.float32)
    # Pad the second Linear to K_pad outputs; padding columns get a -1e30 bias
    # so their softmax probability is exactly 0 (column K is the count column).
    w2p = jnp.zeros((C, K_pad), jnp.float32).at[:, :K].set(
        w2.astype(jnp.float32)).astype(jnp.bfloat16)
    b2p = jnp.full((1, K_pad), -1e30, jnp.float32).at[0, :K].set(
        b2.astype(jnp.float32))

    # Voxel padding: zero features, out-of-range superpoint id -> zero one-hot.
    x_pad = jnp.zeros((N_pad, C), jnp.bfloat16).at[:N].set(
        voxel_feat.astype(jnp.bfloat16))
    spps_pad = jnp.full((1, N_pad), S_pad, jnp.int32).at[0, :N].set(
        voxel_spps.astype(jnp.int32))

    const = lambda shape: pl.BlockSpec(shape, lambda c, i: (0,) * len(shape))

    sem_pad, psum = pl.pallas_call(
        _ia_pass1_kernel,
        out_shape=(
            jax.ShapeDtypeStruct((N_pad, K), jnp.float32),            # voxel softmax
            jax.ShapeDtypeStruct((NUM_SPLITS, S_pad, K_pad), jnp.float32),
        ),
        grid=(NUM_SPLITS, half),
        in_specs=[
            pl.BlockSpec((TILE_N, C), lambda c, i: (c * half + i, 0)),  # x tile
            const((C, C)), const((1, C)),                               # folded w1, b1
            const((C, K_pad)), const((1, K_pad)),                       # padded w2, b2
            pl.BlockSpec((1, TILE_N), lambda c, i: (0, c * half + i)),  # spp id tile
        ],
        out_specs=[
            pl.BlockSpec((TILE_N, K), lambda c, i: (c * half + i, 0)),
            # one resident accumulator slab per core split (no VMEM scratch)
            pl.BlockSpec((None, S_pad, K_pad), lambda c, i: (c, 0, 0)),
        ],
        compiler_params=pltpu.CompilerParams(
            dimension_semantics=("parallel", "arbitrary"),
            vmem_limit_bytes=vmem_limit),
    )(x_pad, w1f, b1f, w2p, b2p, spps_pad)

    # ---- tiny epilogue in plain XLA (replaces the old finalize + pass-2) ----
    sums = jnp.sum(psum, axis=0)                            # [S_pad, K_pad]
    counts = jnp.maximum(sums[:, K:K + 1], 1.0)             # exact voxel counts
    spp_sm_pad = sums[:, :K] / counts                       # scatter_mean
    spp_cond_pad = jnp.any(spp_sm_pad[:, 2:] >= FILTER_BG_THRESH, axis=-1)

    sem_sm = sem_pad[:N]
    spp_sm = spp_sm_pad[:S]
    spp_cond = spp_cond_pad[:S]
    # object_conditions = spp_object_conditions[voxel_spps]: O(N) HBM gather.
    object_conditions = spp_cond_pad[voxel_spps]
    return sem_sm, spp_sm, spp_cond, object_conditions


def get_batch_offsets(batch_idxs, valid_mask, bs):
    """JAX version of PSGformer.get_batch_offsets (glue)."""
    counts = jnp.stack(
        [jnp.sum(((batch_idxs == i) & valid_mask).astype(jnp.int32))
         for i in range(bs)])
    return jnp.concatenate(
        [jnp.zeros((1,), jnp.int32), jnp.cumsum(counts).astype(jnp.int32)])


def psgformer_ia_aware_forward(voxel_feat, batch_idxs, coords_float,
                               voxel_spps, num_spp, batch_size, params,
                               tile_n=None):
    """IA_aware forward: Pallas kernel for the hot path, fixed-size filtering glue."""
    sem_sm, spp_sm, spp_cond, object_conditions = ia_aware_pallas(
        voxel_feat, voxel_spps, num_spp, params, tile_n=tile_n)

    N = voxel_feat.shape[0]
    # TODO(synk): the torch code early-exits when <=100 object voxels remain;
    # that data-dependent branch / dynamic shape is resolved with a fixed-size
    # nonzero + validity mask instead.
    object_idxs = jnp.nonzero(object_conditions, size=N, fill_value=0)[0]
    n_obj = jnp.sum(object_conditions.astype(jnp.int32))
    valid = jnp.arange(N) < n_obj

    voxel_batch_idxs_ = jnp.where(valid, batch_idxs[object_idxs], -1)
    voxel_output_feats_ = jnp.where(valid[:, None], voxel_feat[object_idxs], 0.0)
    voxel_coords_float_ = jnp.where(valid[:, None], coords_float[object_idxs], 0.0)
    voxel_batch_offsets_ = get_batch_offsets(voxel_batch_idxs_, valid, batch_size)

    # TODO(synk): aggregator (LocalAggregator), decoder (QueryDecoder) and
    # criterion are external modules with no definition in the reference file.
    return dict(
        semantic_scores_sm=sem_sm,
        spp_semantic_scores_sm=spp_sm,
        spp_object_conditions=spp_cond,
        object_conditions=object_conditions,
        voxel_batch_idxs_=voxel_batch_idxs_,
        voxel_output_feats_=voxel_output_feats_,
        voxel_coords_float_=voxel_coords_float_,
        voxel_batch_offsets_=voxel_batch_offsets_,
        n_object_voxels=n_obj,
    )


def init_params(key, channels, num_class):
    """Deterministic synthetic parameters for semantic_linear (2-layer MLP + BN)."""
    K = num_class + 2
    ks = jax.random.split(key, 8)
    w1 = jax.random.normal(ks[0], (channels, channels), jnp.float32) * 0.1
    b1 = jax.random.normal(ks[1], (channels,), jnp.float32) * 0.01
    bn_gamma = 0.5 + jax.random.uniform(ks[2], (channels,), jnp.float32)
    bn_beta = jax.random.normal(ks[3], (channels,), jnp.float32) * 0.1
    bn_mean = jax.random.normal(ks[4], (channels,), jnp.float32) * 0.1
    bn_var = 0.5 + jax.random.uniform(ks[5], (channels,), jnp.float32)
    w2 = jax.random.normal(ks[6], (channels, K), jnp.float32) * 0.1
    b2 = jax.random.normal(ks[7], (K,), jnp.float32) * 0.01
    return (w1, b1, bn_gamma, bn_beta, bn_mean, bn_var, w2, b2)


def _ref_ia_aware(voxel_feat, voxel_spps, S, params):
    """Pure-JAX f32 reference of IA_aware's tensor math (for the sanity check)."""
    w1, b1, g, beta, mu, var, w2, b2 = params
    hp = jax.lax.Precision.HIGHEST
    h = jnp.dot(voxel_feat, w1, precision=hp) + b1
    h = (h - mu) / jnp.sqrt(var + BN_EPS) * g + beta
    h = jnp.maximum(h, 0.0)
    logits = jnp.dot(h, w2, precision=hp) + b2
    sm = jax.nn.softmax(logits, axis=1)
    sums = jax.ops.segment_sum(sm, voxel_spps, num_segments=S)
    cnt = jax.ops.segment_sum(jnp.ones((voxel_feat.shape[0],), jnp.float32),
                              voxel_spps, num_segments=S)
    spp_sm = sums / jnp.maximum(cnt[:, None], 1.0)
    spp_cond = jnp.any(spp_sm[:, 2:] >= FILTER_BG_THRESH, axis=-1)
    vox_cond = spp_cond[voxel_spps]
    return sm, spp_sm, spp_cond, vox_cond


if __name__ == "__main__":
    key = jax.random.PRNGKey(0)
    N = 700      # voxels (not a multiple of the tile -> exercises N padding)
    C = 32       # media == channels
    S = 13       # superpoints (not a multiple of 8 -> exercises S padding)
    BATCH = 2
    TILE_N = 256  # small tile -> multiple accumulation steps per core split

    k_feat, k_spp, k_coord, k_par = jax.random.split(key, 4)
    voxel_feat = jax.random.normal(k_feat, (N, C), jnp.float32)
    voxel_spps = jax.random.randint(k_spp, (N,), 0, S, jnp.int32)
    coords_float = jax.random.uniform(k_coord, (N, 3), jnp.float32)
    batch_idxs = jnp.concatenate(
        [jnp.zeros((N // 2,), jnp.int32), jnp.ones((N - N // 2,), jnp.int32)])
    params = init_params(k_par, C, NUM_CLASS)

    out = psgformer_ia_aware_forward(voxel_feat, batch_idxs, coords_float,
                                     voxel_spps, S, BATCH, params,
                                     tile_n=TILE_N)
    jax.block_until_ready(out)

    sem_sm = out["semantic_scores_sm"]
    spp_sm = out["spp_semantic_scores_sm"]
    spp_cond = out["spp_object_conditions"]
    obj_cond = out["object_conditions"]

    assert sem_sm.shape == (N, NUM_CLASS + 2)
    assert spp_sm.shape == (S, NUM_CLASS + 2)
    assert spp_cond.shape == (S,)
    assert obj_cond.shape == (N,)

    # softmax rows sum to ~1 (approx-reciprocal denominator -> loose tol)
    assert bool(jnp.allclose(jnp.sum(sem_sm, axis=-1), 1.0, atol=1e-2))

    # compare against a pure-JAX f32 reference (bf16 MXU operands -> loose tol)
    ref_sm, ref_spp_sm, _, _ = _ref_ia_aware(voxel_feat, voxel_spps, S, params)
    assert bool(jnp.allclose(sem_sm, ref_sm, atol=2e-2))
    assert bool(jnp.allclose(spp_sm, ref_spp_sm, atol=3e-2))

    # self-consistency of threshold + gather (exact: same floats / 0-1 values)
    assert bool(jnp.array_equal(
        spp_cond, jnp.any(spp_sm[:, 2:] >= FILTER_BG_THRESH, axis=-1)))
    assert bool(jnp.array_equal(obj_cond, spp_cond[voxel_spps]))

    print("KERNEL_OK")
</pallas_src>

<mosaic_0001>
module attributes {stable_mosaic.version = 11 : i64} {
  func.func @_ia_pass1_kernel(%arg0: i32, %arg1: i32, %arg2: memref<256x32xbf16, #tpu.memory_space<vmem>>, %arg3: memref<32x32xbf16, #tpu.memory_space<vmem>>, %arg4: memref<1x32xf32, #tpu.memory_space<vmem>>, %arg5: memref<32x24xbf16, #tpu.memory_space<vmem>>, %arg6: memref<1x24xf32, #tpu.memory_space<vmem>>, %arg7: memref<1x256xi32, #tpu.memory_space<vmem>>, %arg8: memref<256x20xf32, #tpu.memory_space<vmem>>, %arg9: memref<1x16x24xf32, #tpu.memory_space<vmem>>) attributes {dimension_semantics = [#tpu.dimension_semantics<parallel>, #tpu.dimension_semantics<arbitrary>], iteration_bounds = array<i64: 2, 2>, scalar_prefetch = 0 : i64, scratch_operands = 0 : i64, tpu.core_type = #tpu.core_type<tc>, window_params = [{transform_indices = @transform_0, window_bounds = array<i64: 256, 32>}, {pipeline_mode = #tpu.pipeline_mode<synchronous>, transform_indices = @transform_1, window_bounds = array<i64: 32, 32>}, {pipeline_mode = #tpu.pipeline_mode<synchronous>, transform_indices = @transform_2, window_bounds = array<i64: 1, 32>}, {pipeline_mode = #tpu.pipeline_mode<synchronous>, transform_indices = @transform_3, window_bounds = array<i64: 32, 24>}, {pipeline_mode = #tpu.pipeline_mode<synchronous>, transform_indices = @transform_4, window_bounds = array<i64: 1, 24>}, {transform_indices = @transform_5, window_bounds = array<i64: 1, 256>}, {transform_indices = @transform_6, window_bounds = array<i64: 256, 20>}, {transform_indices = @transform_7, window_bounds = array<i64: 1, 16, 24>}]} {
    %c0_i32 = arith.constant 0 : i32
    %0 = arith.cmpi eq, %arg1, %c0_i32 : i32
    %1 = arith.extui %0 : i1 to i32
    %c0_i32_0 = arith.constant 0 : i32
    %2 = arith.cmpi ne, %1, %c0_i32_0 : i32
    scf.if %2 {
      %cst_26 = arith.constant 0.000000e+00 : f32
      %52 = vector.broadcast %cst_26 : f32 to vector<16x24xf32>
      %c0_27 = arith.constant 0 : index
      %c0_28 = arith.constant 0 : index
      %c0_29 = arith.constant 0 : index
      %53 = vector.load %arg9[%c0_27, %c0_28, %c0_29] : memref<1x16x24xf32, #tpu.memory_space<vmem>>, vector<1x16x24xf32>
      %54 = vector.shape_cast %53 : vector<1x16x24xf32> to vector<16x24xf32>
      %55 = vector.shape_cast %52 : vector<16x24xf32> to vector<1x16x24xf32>
      tpu.vector_store %arg9[%c0_27, %c0_28, %c0_29], %55 {strides = array<i32>} : memref<1x16x24xf32, #tpu.memory_space<vmem>>, vector<1x16x24xf32>,
    } else {
    }
    %c0 = arith.constant 0 : index
    %c0_1 = arith.constant 0 : index
    %3 = vector.load %arg2[%c0, %c0_1] : memref<256x32xbf16, #tpu.memory_space<vmem>>, vector<256x32xbf16>
    %c0_2 = arith.constant 0 : index
    %c0_3 = arith.constant 0 : index
    %4 = vector.load %arg3[%c0_2, %c0_3] : memref<32x32xbf16, #tpu.memory_space<vmem>>, vector<32x32xbf16>
    %cst = arith.constant dense<0.000000e+00> : vector<256x32xf32>
    %5 = tpu.matmul %3, %4, %cst {dimension_numbers = #tpu.dot_dimension_numbers<[1], [0], [0], [1], [0, 0, 1, 1], [], []>} : vector<256x32xbf16>, vector<32x32xbf16>, vector<256x32xf32> -> vector<256x32xf32>
    %c0_4 = arith.constant 0 : index
    %c0_5 = arith.constant 0 : index
    %6 = vector.load %arg4[%c0_4, %c0_5] : memref<1x32xf32, #tpu.memory_space<vmem>>, vector<1x32xf32>
    %7 = vector.broadcast %6 : vector<1x32xf32> to vector<256x32xf32>
    %8 = arith.addf %5, %7 : vector<256x32xf32>
    %cst_6 = arith.constant 0.000000e+00 : f32
    %9 = vector.broadcast %cst_6 : f32 to vector<256x32xf32>
    %10 = arith.maximumf %8, %9 : vector<256x32xf32>
    %11 = arith.truncf %10 : vector<256x32xf32> to vector<256x32xbf16>
    %c0_7 = arith.constant 0 : index
    %c0_8 = arith.constant 0 : index
    %12 = vector.load %arg5[%c0_7, %c0_8] : memref<32x24xbf16, #tpu.memory_space<vmem>>, vector<32x24xbf16>
    %cst_9 = arith.constant dense<0.000000e+00> : vector<256x24xf32>
    %13 = tpu.matmul %11, %12, %cst_9 {dimension_numbers = #tpu.dot_dimension_numbers<[1], [0], [0], [1], [0, 0, 1, 1], [], []>} : vector<256x32xbf16>, vector<32x24xbf16>, vector<256x24xf32> -> vector<256x24xf32>
    %c0_10 = arith.constant 0 : index
    %c0_11 = arith.constant 0 : index
    %14 = vector.load %arg6[%c0_10, %c0_11] : memref<1x24xf32, #tpu.memory_space<vmem>>, vector<1x24xf32>
    %15 = vector.broadcast %14 : vector<1x24xf32> to vector<256x24xf32>
    %16 = arith.addf %13, %15 : vector<256x24xf32>
    %cst_12 = arith.constant dense<0xFF800000> : vector<256xf32>
    %17 = vector.multi_reduction <maximumf>, %16, %cst_12 [1] : vector<256x24xf32> to vector<256xf32>
    %18 = vector.shape_cast %17 : vector<256xf32> to vector<256x1xf32>
    %19 = vector.broadcast %18 : vector<256x1xf32> to vector<256x24xf32>
    %20 = arith.subf %16, %19 : vector<256x24xf32>
    %21 = math.exp %20 : vector<256x24xf32>
    %cst_13 = arith.constant dense<0.000000e+00> : vector<256xf32>
    %22 = vector.multi_reduction <add>, %21, %cst_13 [1] : vector<256x24xf32> to vector<256xf32>
    %23 = vector.shape_cast %22 : vector<256xf32> to vector<256x1xf32>
    %24 = tpu.reciprocal %23 {approx = true} : vector<256x1xf32> -> vector<256x1xf32>
    %25 = vector.broadcast %24 : vector<256x1xf32> to vector<256x24xf32>
    %26 = arith.mulf %21, %25 : vector<256x24xf32>
    %27 = vector.extract_strided_slice %26 {offsets = [0, 0], sizes = [256, 20], strides = [1, 1]} : vector<256x24xf32> to vector<256x20xf32>
    %c0_14 = arith.constant 0 : index
    %c0_15 = arith.constant 0 : index
    %28 = vector.load %arg8[%c0_14, %c0_15] : memref<256x20xf32, #tpu.memory_space<vmem>>, vector<256x20xf32>
    tpu.vector_store %arg8[%c0_14, %c0_15], %27 {strides = array<i32>} : memref<256x20xf32, #tpu.memory_space<vmem>>, vector<256x20xf32>,
    %29 = tpu.iota {dimensions = array<i32: 1>} : vector<1x24xi32>
    %c20_i32 = arith.constant 20 : i32
    %30 = vector.broadcast %c20_i32 : i32 to vector<1x24xi32>
    %31 = arith.cmpi eq, %29, %30 : vector<1x24xi32>
    %cst_16 = arith.constant 1.000000e+00 : f32
    %32 = vector.shape_cast %31 : vector<1x24xi1> to vector<1x24xi1>
    %33 = vector.broadcast %32 : vector<1x24xi1> to vector<256x24xi1>
    %34 = vector.broadcast %cst_16 : f32 to vector<256x24xf32>
    %35 = arith.select %33, %34, %26 : vector<256x24xi1>, vector<256x24xf32>
    %36 = arith.truncf %35 : vector<256x24xf32> to vector<256x24xbf16>
    %37 = tpu.iota {dimensions = array<i32: 0>} : vector<16x1xi32>
    %c0_17 = arith.constant 0 : index
    %c0_18 = arith.constant 0 : index
    %38 = vector.load %arg7[%c0_17, %c0_18] : memref<1x256xi32, #tpu.memory_space<vmem>>, vector<1x256xi32>
    %39 = vector.broadcast %37 : vector<16x1xi32> to vector<16x256xi32>
    %40 = vector.broadcast %38 : vector<1x256xi32> to vector<16x256xi32>
    %41 = arith.cmpi eq, %39, %40 : vector<16x256xi32>
    %42 = arith.extui %41 : vector<16x256xi1> to vector<16x256xi32>
    %43 = arith.sitofp %42 : vector<16x256xi32> to vector<16x256xf32>
    %44 = arith.truncf %43 : vector<16x256xf32> to vector<16x256xbf16>
    %c0_19 = arith.constant 0 : index
    %c0_20 = arith.constant 0 : index
    %c0_21 = arith.constant 0 : index
    %45 = vector.load %arg9[%c0_19, %c0_20, %c0_21] : memref<1x16x24xf32, #tpu.memory_space<vmem>>, vector<1x16x24xf32>
    %46 = vector.shape_cast %45 : vector<1x16x24xf32> to vector<16x24xf32>
    %cst_22 = arith.constant dense<0.000000e+00> : vector<16x24xf32>
    %47 = tpu.matmul %44, %36, %cst_22 {dimension_numbers = #tpu.dot_dimension_numbers<[1], [0], [0], [1], [0, 0, 1, 1], [], []>} : vector<16x256xbf16>, vector<256x24xbf16>, vector<16x24xf32> -> vector<16x24xf32>
    %48 = arith.addf %46, %47 : vector<16x24xf32>
    %c0_23 = arith.constant 0 : index
    %c0_24 = arith.constant 0 : index
    %c0_25 = arith.constant 0 : index
    %49 = vector.load %arg9[%c0_23, %c0_24, %c0_25] : memref<1x16x24xf32, #tpu.memory_space<vmem>>, vector<1x16x24xf32>
    %50 = vector.shape_cast %49 : vector<1x16x24xf32> to vector<16x24xf32>
    %51 = vector.shape_cast %48 : vector<16x24xf32> to vector<1x16x24xf32>
    tpu.vector_store %arg9[%c0_23, %c0_24, %c0_25], %51 {strides = array<i32>} : memref<1x16x24xf32, #tpu.memory_space<vmem>>, vector<1x16x24xf32>,
    return
  }
  func.func @transform_0(%arg0: i32, %arg1: i32) -> (i32, i32) {
    %c2_i32 = arith.constant 2 : i32
    %0 = arith.muli %arg0, %c2_i32 : i32
    %1 = arith.addi %0, %arg1 : i32
    %c0_i32 = arith.constant 0 : i32
    %c0_i32_0 = arith.constant 0 : i32
    return %1, %c0_i32 : i32, i32
  }
  func.func @transform_1(%arg0: i32, %arg1: i32) -> (i32, i32) {
    %c0_i32 = arith.constant 0 : i32
    %c0_i32_0 = arith.constant 0 : i32
    %c0_i32_1 = arith.constant 0 : i32
    return %c0_i32, %c0_i32_0 : i32, i32
  }
  func.func @transform_2(%arg0: i32, %arg1: i32) -> (i32, i32) {
    %c0_i32 = arith.constant 0 : i32
    %c0_i32_0 = arith.constant 0 : i32
    %c0_i32_1 = arith.constant 0 : i32
    return %c0_i32, %c0_i32_0 : i32, i32
  }
  func.func @transform_3(%arg0: i32, %arg1: i32) -> (i32, i32) {
    %c0_i32 = arith.constant 0 : i32
    %c0_i32_0 = arith.constant 0 : i32
    %c0_i32_1 = arith.constant 0 : i32
    return %c0_i32, %c0_i32_0 : i32, i32
  }
  func.func @transform_4(%arg0: i32, %arg1: i32) -> (i32, i32) {
    %c0_i32 = arith.constant 0 : i32
    %c0_i32_0 = arith.constant 0 : i32
    %c0_i32_1 = arith.constant 0 : i32
    return %c0_i32, %c0_i32_0 : i32, i32
  }
  func.func @transform_5(%arg0: i32, %arg1: i32) -> (i32, i32) {
    %c2_i32 = arith.constant 2 : i32
    %0 = arith.muli %arg0, %c2_i32 : i32
    %1 = arith.addi %0, %arg1 : i32
    %c0_i32 = arith.constant 0 : i32
    %c0_i32_0 = arith.constant 0 : i32
    return %c0_i32, %1 : i32, i32
  }
  func.func @transform_6(%arg0: i32, %arg1: i32) -> (i32, i32) {
    %c2_i32 = arith.constant 2 : i32
    %0 = arith.muli %arg0, %c2_i32 : i32
    %1 = arith.addi %0, %arg1 : i32
    %c0_i32 = arith.constant 0 : i32
    %c0_i32_0 = arith.constant 0 : i32
    return %1, %c0_i32 : i32, i32
  }
  func.func @transform_7(%arg0: i32, %arg1: i32) -> (i32, i32, i32) {
    %c0_i32 = arith.constant 0 : i32
    %c0_i32_0 = arith.constant 0 : i32
    %c0_i32_1 = arith.constant 0 : i32
    return %arg0, %c0_i32, %c0_i32_0 : i32, i32, i32
  }
}

</mosaic_0001>

<bundles_post_ra>
// kernel: tpu_custom_call.1
= control target key start
LH: loop header
LB: loop body
LE: loop exit
PB: predicated region body
PF: predicated region fallthrough
CT: control target
= control target key end

     0   :  { %13 = vsyncpa [#allocation3], 0  ;;  %s3034_s0 = inlined_call_operand.vmem [shape: bf16[1024,32], index: 0, kind: input, shape index: {}]   ;;  %s3035_s1 = inlined_call_operand.vmem [shape: bf16[32,32], index: 1, kind: input, shape index: {}]   ;;  %s3036_s2 = inlined_call_operand.vmem [shape: f32[1,32], index: 2, kind: input, shape index: {}]   ;;  %s3037_s3 = inlined_call_operand.vmem [shape: bf16[32,24], index: 3, kind: input, shape index: {}]   ;;  %s3038_s4 = inlined_call_operand.vmem [shape: f32[1,24], index: 4, kind: input, shape index: {}]   ;;  %s3039_s5 = inlined_call_operand.vmem [shape: s32[1,1024], index: 5, kind: input, shape index: {}]   ;;  %s3040_s6 = inlined_call_operand.vmem [shape: f32[1024,20], index: 6, kind: output, shape index: {0}]   ;;  %s3041_s7 = inlined_call_operand.hbm [shape: f32[2,16,24], index: 7, kind: output, shape index: {1}]  }
   0x1   :  { %15 = vsyncpa [#allocation3 + $0x1], 0  ;;  %s2226_s24 = smov 0   ;;  %s2228_s25 = smov 0  }
   0x2   :  { %s2230_s26 = smov 0   ;;  %s2232_s27 = smov 0  }
   0x3   :  { %s2234_s28 = smov 0   ;;  %s2236_s29 = smov 0  }
   0x4   :  { %s2238_s30 = smov 0   ;;  %s2240_s8 = smov 0  }
   0x5 LB: > { %3046 = sst [smem:[#allocation5_spill]] %s2171_s29  ;;  %s1643_s9 = sadd.s32 4294967295, %s2179_s8   ;;  %s2179_s8 = sphi %s2240_s8, %s21_s8   ;;  %s2175_s30 = sphi %s2238_s30, %s3060_s30   ;;  %s2171_s29 = sphi %s2236_s29, %s3059_s29   ;;  %s2167_s28 = sphi %s2234_s28, %s3058_s28   ;;  %s2163_s27 = sphi %s2232_s27, %s3057_s27   ;;  %s2159_s26 = sphi %s2230_s26, %s3063_s26   ;;  %s2155_s25 = sphi %s2228_s25, %s3062_s25   ;;  %s2151_s24 = sphi %s2226_s24, %s3061_s24  }
   0x6   : > { %3047 = sst [smem:[#allocation6_spill]] %s2175_s30  ;;  %s1644_s10 = sadd.s32 4294967294, %s2179_s8  }
   0x7   : > { %s30_s11 = sadd.s32 1, %s2171_s29  ;;  %s33_s12 = sadd.s32 1, %s2175_s30 }
   0x8   : > { %p31_p0 = scmp.ge.s32.totalorder %s30_s11, 2  ;;  %p224_p1 = scmp.ne.s32.totalorder %s2159_s26, %s2155_s25 }
   0x9   : > { %p225_p2 = scmp.eq.s32.totalorder %s1643_s9, 3  ;;  %p230_p4 = scmp.ne.s32.totalorder %s2155_s25, %s2151_s24 }
   0xa   : > { %s3065_s11 = smov (%p31_p0, %s30_s11), 0  ;;  %s3067_s12 = smov (!%p31_p0, %s33_s12), %s2175_s30 }
   0xb   : > { %3048 = sst [smem:[#allocation7_spill]] %s3065_s11  ;;  %p2275_p3 = por %p225_p2, %p224_p1 }
   0xc   : > { %p35_p5 = scmp.ge.s32.totalorder %s3067_s12, 2  ;;  %p231_p6 = scmp.eq.s32.totalorder %s1644_s10, 3 }
   0xd   : > { %p1653_p7 = scmp.ge.s32.totalorder %s2179_s8, 1  ;;  %p286_p8 = scmp.lt.s32.totalorder %s2179_s8, 5 }
   0xe   : > { %s3069_s12 = smov (%p35_p5, %s3067_s12), 0  ;;  %p2285_p9 = por %p231_p6, %p230_p4 }
   0xf   : > { %3050 = sst [smem:[#allocation8_spill]] %s3069_s12  ;;  %p287_p10 = pnand %p1653_p7, %p286_p8 }
  0x10   : > { %s211_s15 = ssub.s32 %s2175_s30, %s3069_s12  ;;  %s214_s16 = sadd.s32 1, %s2159_s26 }
  0x11   : > { %p212_p11 = scmp.eq.s32.totalorder %s211_s15, 0  ;;  %290 = sbr.rel (%p287_p10) target bundleno = 1107 (0x453), region = 44 }
  0x12   : > { %s3044_s18 = sand.u32 (!%p287_p10), 1, %s2155_s25   ;;  %s1655_s19 = sshll.u32 (!%p287_p10), %s2167_s28, 1 }
  0x13   : > { %s2293_s17 = scalar_select %p212_p11, %s2159_s26, %s214_s16  }
  0x14   : > { %s1654_s20 = sshll.u32 (!%p287_p10), %s3044_s18, 4  ;;  %s334_s21 = sadd.s32 (!%p287_p10), %s2163_s27, %s1655_s19 }
  0x15   : > { %3052 = sst [smem:[#allocation9_spill]] %s2293_s17  ;;  %s1656_s22 = sshll.u32 (!%p287_p10), %s334_s21, 5 }
  0x16   : > { %p336_p12 = scmp.lt.s32.totalorder (!%p287_p10), %s1656_s22, 127  ;;  %s1659_s23 = sshll.u32 (!%p287_p10), %s334_s21, 1 }
  0x17   : > { %p346_p13 = scmp.lt.s32.totalorder (!%p287_p10), %s1659_s23, 7  ;;  %s2316_s17 = scalar_lea.vmem (!%p287_p10), [#allocation2], %s1654_s20 }
  0x18   : > { %s3071_s22 = smov (!%p336_p12, %s1656_s22), 127  ;;  %p1663_p0 = scmp.ne.s32.totalorder %s2163_s27, 0 }
  0x19   : > { %s3073_s23 = smov (!%p346_p13, %s1659_s23), 7  ;;  %s1657_s9 = sshll.u32 %s3071_s22, 2  ;;  %vm367_vm0 = vcmask (!%p1663_p0), 195584   ;;  %v2181_v0 = vmov (!%p1663_p0), 0.0  }
  0x1a   : > { %s1662_s10 = sshll.u32 %s3071_s22, 3  ;;  %s2305_s12 = scalar_lea.vmem %s3034_s0, %s1657_s9  ;;  %368 = vst.msk [vmem:[%s2316_s17] sm:$0xff] (!%p1663_p0), %vm367_vm0, %v2181_v0  ;;  %369 = vst.msk [vmem:[%s2316_s17 + $0x8] sm:$0xff] (!%p1663_p0), %vm367_vm0, %v2181_v0 }
  0x1b   : > { %s348_s18 = scalar_lea.vmem %s3039_s5, %s3073_s23  ;;  %s2314_s21 = scalar_lea.vmem %s3040_s6, %s1662_s10 }
  0x1c   : > { %366 = sbr.rel (%p1663_p0) target bundleno = 35 (0x23), region = 48 }
  0x23 PF: > { %v1937_v1 = vld [vmem:[%s3035_s1] sm:$0xff]   ;;  %v1938_v2 = vld [vmem:[%s3035_s1 + $0x8] sm:$0xff]   ;;  %vm505_vm1 = vcmask 261120   ;;  %v1941_v5 = vld [vmem:[%s2305_s12 + $0x10] sm:$0xff]   ;;  %vm995_vm2 = vcmask 195584   ;;  %vm1348_vm9 = vcmask 162816  }
  0x24   : > { %1790 = vmatprep.subr.bf16.mxu0 %v1937_v1  ;;  %v1939_v3 = vld [vmem:[%s2305_s12] sm:$0xff]   ;;  %v1940_v4 = vld [vmem:[%s2305_s12 + $0x8] sm:$0xff]   ;;  %v1942_v6 = vld [vmem:[%s2305_s12 + $0x18] sm:$0xff]   ;;  %s1534_s23 = sshll.u32 %s2316_s17, 4  ;;  %s2183_s9 = smov [#allocation2]   ;;  %s2974_s23 = int_to_ptr.vmem [resolvable:$true] %s1534_s23 }
  0x25   : > { %1791 = vmatpush3.bf16.msra.mxu0 %v1937_v1  ;;  %1794 = vmatprep.mubr.msk.bf16.mxu0 %vm505_vm1, %v1939_v3  ;;  %v1943_v7 = vld [vmem:[%s2305_s12 + $0x20] sm:$0xff]   ;;  %v1944_v8 = vld [vmem:[%s2305_s12 + $0x28] sm:$0xff]   ;;  %v1945_v9 = vld [vmem:[%s2305_s12 + $0x30] sm:$0xff]   ;;  %s2085_s20 = scalar_lea.vmem %s2974_s23, 256  ;;  %s2089_s10 = sshll.u32 %s2183_s9, 4  ;;  %s2090_s10 = int_to_ptr.vmem [resolvable:$false] %s2089_s10 }
  0x26   : > { %1792 = vmatprep.subr.bf16.mxu0 %v1938_v2  ;;  %v1946_v10 = vld [vmem:[%s2305_s12 + $0x38] sm:$0xff]   ;;  %v1947_v11 = vld [vmem:[%s2305_s12 + $0x40] sm:$0xff]   ;;  %v1948_v12 = vld [vmem:[%s2305_s12 + $0x48] sm:$0xff]   ;;  %p2086_p1 = scmp.ne.s32.totalorder %s2974_s23, %s2085_s20  ;;  %s2091_s15 = scalar_lea.vmem %s2090_s10, 512 }
  0x27   : > { %v1949_v13 = vld [vmem:[%s2305_s12 + $0x50] sm:$0xff]   ;;  %v1950_v14 = vld [vmem:[%s2305_s12 + $0x58] sm:$0xff]   ;;  %v1951_v15 = vld [vmem:[%s2305_s12 + $0x60] sm:$0xff]   ;;  %p2092_p5 = scmp.lt.s32.totalorder %s2974_s23, %s2090_s10  ;;  %p2093_p6 = scmp.lt.s32.totalorder %s2091_s15, %s2085_s20 }
  0x28   : > { %v1952_v16 = vld [vmem:[%s2305_s12 + $0x68] sm:$0xff]   ;;  %v1953_v17 = vld [vmem:[%s2305_s12 + $0x70] sm:$0xff]   ;;  %v1954_v18 = vld [vmem:[%s2305_s12 + $0x78] sm:$0xff]   ;;  %p2087_p2 = pnand %p2086_p1, %p2275_p3 }
  0x29   : > { %1793 = vmatpush3.bf16.msra.mxu0 %v1938_v2  ;;  %v1955_v19 = vld [vmem:[%s3037_s3] sm:$0xff]   ;;  %v1956_v20 = vld [vmem:[%s3037_s3 + $0x8] sm:$0xff]   ;;  %p2094_p7 = por %p2093_p6, %p2092_p5 }
  0x2a   : > { %1826 = vmatprep.subr.bf16.mxu1 %v1955_v19  ;;  %v2368_v21 = vld [vmem:[%s3036_s2] ss:$0 sm:$0xff]  ;;  %p2088_p4 = pneg %p2087_p2 }
  0x2b   : > { %1827 = vmatpush3.bf16.msra.mxu1 %v1955_v19 }
  0x2c   : > { %1795 = vmatmul.mubr.msk.bf16.vlgmr.msra.gmra.mrb[0].mxu0 %vm505_vm1, %v1940_v4  ;;  %1828 = vmatprep.subr.bf16.mxu1 %v1956_v20  ;;  %p2095_p8 = pnand %p2094_p7, %p2088_p4 }
  0x2d   : > { %1798 = vmatprep.mubr.msk.bf16.mxu0 %vm505_vm1, %v1941_v5 }
  0x2f   : > { %1829 = vmatpush3.bf16.msra.mxu1 %v1956_v20 }
  0x34   : > { %1799 = vmatmul.mubr.msk.bf16.gmra.mrb[4].mxu0 %vm505_vm1, %v1942_v6 }
  0x35   : > { %1802 = vmatprep.mubr.msk.bf16.mxu0 %vm505_vm1, %v1943_v7 }
  0x3c   : > { %1803 = vmatmul.mubr.msk.bf16.gmra.mrb[8].mxu0 %vm505_vm1, %v1944_v8 }
  0x3d   : > { %1806 = vmatprep.mubr.msk.bf16.mxu0 %vm505_vm1, %v1945_v9 }
  0x44   : > { %1807 = vmatmul.mubr.msk.bf16.gmra.mrb[12].mxu0 %vm505_vm1, %v1946_v10 }
  0x45   : > { %1810 = vmatprep.mubr.msk.bf16.mxu0 %vm505_vm1, %v1947_v11 }
  0x4c   : > { %1811 = vmatmul.mubr.msk.bf16.gmra.mrb[16].mxu0 %vm505_vm1, %v1948_v12 }
  0x4d   : > { %1814 = vmatprep.mubr.msk.bf16.mxu0 %vm505_vm1, %v1949_v13 }
  0x54   : > { %1815 = vmatmul.mubr.msk.bf16.gmra.mrb[20].mxu0 %vm505_vm1, %v1950_v14 }
  0x55   : > { %1818 = vmatprep.mubr.msk.bf16.mxu0 %vm505_vm1, %v1951_v15 }
  0x5c   : > { %1819 = vmatmul.mubr.msk.bf16.gmra.mrb[24].mxu0 %vm505_vm1, %v1952_v16 }
  0x5d   : > { %1822 = vmatprep.mubr.msk.bf16.mxu0 %vm505_vm1, %v1953_v17 }
  0x64   : > { %1823 = vmatmul.mubr.msk.bf16.gmra.mrb[28].mxu0 %vm505_vm1, %v1954_v18 }
  0xff   : > { %v1796_v22 = vpop.f32.mrb[0].mxu0 }
 0x100   : > { %v597_v23 = vadd.f32 %v1796_v22, %v2368_v21  ;;  %v588_v24 = vpop.f32.mrb[1].mxu0 }
 0x101   : > { %v589_v25 = vadd.f32 %v2368_v21, %v588_v24  ;;  %v1797_v26 = vpop.f32.mrb[2].mxu0 }
 0x102   : > { %v600_v27 = vadd.f32 %v1797_v26, %v2368_v21  ;;  %v591_v28 = vpop.f32.mrb[3].mxu0  ;;  %v717_v30 = vmax.f32 %v597_v23, 0.0 }
 0x103   : > { %v592_v29 = vadd.f32 %v2368_v21, %v591_v28  ;;  %v715_v32 = vmax.f32 %v589_v25, 0.0 }
 0x104   : > { %v718_v31 = vmax.f32 %v600_v27, 0.0 }
 0x105   : > { %v716_v33 = vmax.f32 %v592_v29, 0.0 }
 0x106   : > { %v748_v34 = vpack.c.bf16 %v718_v31, %v717_v30 }
 0x107   : > { %v1800_v35 = vpop.f32.mrb[4].mxu0  ;;  %v747_v36 = vpack.c.bf16 %v716_v33, %v715_v32 }
 0x108   : > { %v613_v37 = vadd.f32 %v1800_v35, %v2368_v21  ;;  %v604_v38 = vpop.f32.mrb[5].mxu0 }
 0x109   : > { %v605_v39 = vadd.f32 %v2368_v21, %v604_v38  ;;  %v1801_v40 = vpop.f32.mrb[6].mxu0  ;;  %1830 = vmatprep.mubr.msk.bf16.mxu1 %vm505_vm1, %v747_v36 }
 0x10a   : > { %v616_v41 = vadd.f32 %v1801_v40, %v2368_v21  ;;  %v607_v42 = vpop.f32.mrb[7].mxu0  ;;  %1831 = vmatmul.mubr.msk.bf16.vlgmr.msra.gmra.mrb[0].mxu1 %vm505_vm1, %v748_v34  ;;  %v721_v44 = vmax.f32 %v613_v37, 0.0 }
 0x10b   : > { %v608_v43 = vadd.f32 %v2368_v21, %v607_v42  ;;  %v719_v46 = vmax.f32 %v605_v39, 0.0 }
 0x10c   : > { %v722_v45 = vmax.f32 %v616_v41, 0.0 }
 0x10d   : > { %v720_v47 = vmax.f32 %v608_v43, 0.0 }
 0x10e   : > { %v750_v48 = vpack.c.bf16 %v722_v45, %v721_v44 }
 0x10f   : > { %v749_v49 = vpack.c.bf16 %v720_v47, %v719_v46  ;;  %v1804_v50 = vpop.f32.mrb[8].mxu0 }
 0x110   : > { %v629_v51 = vadd.f32 %v1804_v50, %v2368_v21  ;;  %v620_v52 = vpop.f32.mrb[9].mxu0 }
 0x111   : > { %v621_v53 = vadd.f32 %v2368_v21, %v620_v52  ;;  %v1805_v54 = vpop.f32.mrb[10].mxu0  ;;  %1834 = vmatprep.mubr.msk.bf16.mxu1 %vm505_vm1, %v749_v49 }
 0x112   : > { %v632_v55 = vadd.f32 %v1805_v54, %v2368_v21  ;;  %v623_v56 = vpop.f32.mrb[11].mxu0  ;;  %1835 = vmatmul.mubr.msk.bf16.gmra.mrb[4].mxu1 %vm505_vm1, %v750_v48  ;;  %v725_v58 = vmax.f32 %v629_v51, 0.0 }
 0x113   : > { %v624_v57 = vadd.f32 %v2368_v21, %v623_v56  ;;  %v723_v60 = vmax.f32 %v621_v53, 0.0 }
 0x114   : > { %v726_v59 = vmax.f32 %v632_v55, 0.0 }
 0x115   : > { %v724_v61 = vmax.f32 %v624_v57, 0.0 }
 0x116   : > { %v752_v62 = vpack.c.bf16 %v726_v59, %v725_v58 }
 0x117   : > { %v751_v63 = vpack.c.bf16 %v724_v61, %v723_v60  ;;  %v1808_v0 = vpop.f32.mrb[12].mxu0 }
 0x118   : > { %v645_v1 = vadd.f32 %v1808_v0, %v2368_v21  ;;  %v636_v2 = vpop.f32.mrb[13].mxu0 }
 0x119   : > { %v637_v3 = vadd.f32 %v2368_v21, %v636_v2  ;;  %v1809_v4 = vpop.f32.mrb[14].mxu0  ;;  %1838 = vmatprep.mubr.msk.bf16.mxu1 %vm505_vm1, %v751_v63 }
 0x11a   : > { %v648_v5 = vadd.f32 %v1809_v4, %v2368_v21  ;;  %v639_v6 = vpop.f32.mrb[15].mxu0  ;;  %1839 = vmatmul.mubr.msk.bf16.gmra.mrb[8].mxu1 %vm505_vm1, %v752_v62  ;;  %v729_v8 = vmax.f32 %v645_v1, 0.0 }
 0x11b   : > { %v640_v7 = vadd.f32 %v2368_v21, %v639_v6  ;;  %v727_v10 = vmax.f32 %v637_v3, 0.0 }
 0x11c   : > { %v730_v9 = vmax.f32 %v648_v5, 0.0 }
 0x11d   : > { %v728_v11 = vmax.f32 %v640_v7, 0.0  ;;  %v2421_v7 = vld [vmem:[%s3038_s4] ss:$0 sm:$0xff] }
 0x11e   : > { %v754_v12 = vpack.c.bf16 %v730_v9, %v729_v8 }
 0x11f   : > { %v753_v13 = vpack.c.bf16 %v728_v11, %v727_v10  ;;  %v1812_v14 = vpop.f32.mrb[16].mxu0 }
 0x120   : > { %v661_v15 = vadd.f32 %v1812_v14, %v2368_v21  ;;  %v652_v16 = vpop.f32.mrb[17].mxu0 }
 0x121   : > { %v653_v17 = vadd.f32 %v2368_v21, %v652_v16  ;;  %v1813_v18 = vpop.f32.mrb[18].mxu0  ;;  %1842 = vmatprep.mubr.msk.bf16.mxu1 %vm505_vm1, %v753_v13 }
 0x122   : > { %v664_v19 = vadd.f32 %v1813_v18, %v2368_v21  ;;  %v655_v20 = vpop.f32.mrb[19].mxu0  ;;  %1843 = vmatmul.mubr.msk.bf16.gmra.mrb[12].mxu1 %vm505_vm1, %v754_v12  ;;  %v733_v23 = vmax.f32 %v661_v15, 0.0 }
 0x123   : > { %v656_v22 = vadd.f32 %v2368_v21, %v655_v20  ;;  %v731_v25 = vmax.f32 %v653_v17, 0.0 }
 0x124   : > { %v734_v24 = vmax.f32 %v664_v19, 0.0 }
 0x125   : > { %v732_v26 = vmax.f32 %v656_v22, 0.0 }
 0x126   : > { %v756_v27 = vpack.c.bf16 %v734_v24, %v733_v23 }
 0x127   : > { %v755_v28 = vpack.c.bf16 %v732_v26, %v731_v25  ;;  %v1816_v29 = vpop.f32.mrb[20].mxu0 }
 0x128   : > { %v677_v30 = vadd.f32 %v1816_v29, %v2368_v21  ;;  %v668_v31 = vpop.f32.mrb[21].mxu0 }
 0x129   : > { %v669_v32 = vadd.f32 %v2368_v21, %v668_v31  ;;  %v1817_v33 = vpop.f32.mrb[22].mxu0  ;;  %1846 = vmatprep.mubr.msk.bf16.mxu1 %vm505_vm1, %v755_v28 }
 0x12a   : > { %v737_v34 = vmax.f32 %v677_v30, 0.0  ;;  %v680_v35 = vadd.f32 %v1817_v33, %v2368_v21  ;;  %v671_v36 = vpop.f32.mrb[23].mxu0  ;;  %1847 = vmatmul.mubr.msk.bf16.gmra.mrb[16].mxu1 %vm505_vm1, %v756_v27 }
 0x12b   : > { %v735_v37 = vmax.f32 %v669_v32, 0.0  ;;  %v672_v38 = vadd.f32 %v2368_v21, %v671_v36 }
 0x12c   : > { %v738_v39 = vmax.f32 %v680_v35, 0.0 }
 0x12d   : > { %v736_v40 = vmax.f32 %v672_v38, 0.0 }
 0x12e   : > { %v758_v41 = vpack.c.bf16 %v738_v39, %v737_v34 }
 0x12f   : > { %v757_v42 = vpack.c.bf16 %v736_v40, %v735_v37  ;;  %v1820_v43 = vpop.f32.mrb[24].mxu0 }
 0x130   : > { %v693_v44 = vadd.f32 %v1820_v43, %v2368_v21  ;;  %v684_v45 = vpop.f32.mrb[25].mxu0 }
 0x131   : > { %v685_v46 = vadd.f32 %v2368_v21, %v684_v45  ;;  %v1821_v47 = vpop.f32.mrb[26].mxu0  ;;  %1850 = vmatprep.mubr.msk.bf16.mxu1 %vm505_vm1, %v757_v42 }
 0x132   : > { %v741_v48 = vmax.f32 %v693_v44, 0.0  ;;  %v696_v49 = vadd.f32 %v1821_v47, %v2368_v21  ;;  %v687_v50 = vpop.f32.mrb[27].mxu0  ;;  %1851 = vmatmul.mubr.msk.bf16.gmra.mrb[20].mxu1 %vm505_vm1, %v758_v41 }
 0x133   : > { %v739_v51 = vmax.f32 %v685_v46, 0.0  ;;  %v688_v52 = vadd.f32 %v2368_v21, %v687_v50 }
 0x134   : > { %v742_v53 = vmax.f32 %v696_v49, 0.0 }
 0x135   : > { %v740_v54 = vmax.f32 %v688_v52, 0.0 }
 0x136   : > { %v760_v55 = vpack.c.bf16 %v742_v53, %v741_v48 }
 0x137   : > { %v759_v56 = vpack.c.bf16 %v740_v54, %v739_v51  ;;  %v1824_v57 = vpop.f32.mrb[28].mxu0 }
 0x138   : > { %v709_v58 = vadd.f32 %v1824_v57, %v2368_v21  ;;  %v700_v59 = vpop.f32.mrb[29].mxu0 }
 0x139   : > { %1854 = vmatprep.mubr.msk.bf16.mxu1 %vm505_vm1, %v759_v56  ;;  %v701_v60 = vadd.f32 %v2368_v21, %v700_v59  ;;  %v1825_v61 = vpop.f32.mrb[30].mxu0 }
 0x13a   : > { %v745_v62 = vmax.f32 %v709_v58, 0.0  ;;  %1855 = vmatmul.mubr.msk.bf16.gmra.mrb[24].mxu1 %vm505_vm1, %v760_v55  ;;  %v712_v63 = vadd.f32 %v1825_v61, %v2368_v21  ;;  %v703_v0 = vpop.f32.mrb[31].mxu0 }
 0x13b   : > { %v743_v1 = vmax.f32 %v701_v60, 0.0  ;;  %v704_v2 = vadd.f32 %v2368_v21, %v703_v0 }
 0x13c   : > { %v746_v3 = vmax.f32 %v712_v63, 0.0 }
 0x13d   : > { %v744_v4 = vmax.f32 %v704_v2, 0.0 }
 0x13e   : > { %v762_v5 = vpack.c.bf16 %v746_v3, %v745_v62 }
 0x13f   : > { %v761_v6 = vpack.c.bf16 %v744_v4, %v743_v1 }
 0x141   : > { %1858 = vmatprep.mubr.msk.bf16.mxu1 %vm505_vm1, %v761_v6 }
 0x142   : > { %1859 = vmatmul.mubr.msk.bf16.gmra.mrb[28].mxu1 %vm505_vm1, %v762_v5 }
 0x1dd   : > { %v1832_v8 = vpop.f32.mrb[0].mxu1 }
 0x1de   : > { %v2424_v9 = vadd.f32 %v1832_v8, %v2421_v7  ;;  %v868_v10 = vpop.f32.mrb[1].mxu1 }
 0x1df   : > { %v2427_v21 = vadd.f32 %v2421_v7, %v868_v10  ;;  %v1833_v11 = vpop.f32.mrb[2].mxu1 }
 0x1e0   : > { %v871_v12 = vpop.f32.mrb[3].mxu1  ;;  %v1002_v13 = vsel %vm995_vm2, %v2424_v9, -inf  ;;  %v2432_v14 = vadd.f32 %v1833_v11, %v2421_v7 }
 0x1e1   : > { %1003 = vmax.xlane.f32.xlu0 %v1002_v13  ;;  %v996_v15 = vsel %vm995_vm2, %v2427_v21, -inf  ;;  %v2437_v16 = vadd.f32 %v2421_v7, %v871_v12 }
 0x1e2   : > { %997 = vmax.xlane.f32.xlu1 %v996_v15  ;;  %v1005_v18 = vsel %vm995_vm2, %v2432_v14, -inf }
 0x1e3   : > { %v999_v27 = vsel %vm995_vm2, %v2437_v16, -inf }
 0x1e5   : > { %v1836_v17 = vpop.f32.mrb[4].mxu1 }
 0x1e6   : > { %v2442_v19 = vadd.f32 %v1836_v17, %v2421_v7  ;;  %v884_v20 = vpop.f32.mrb[5].mxu1  ;;  %1006 = vmax.xlane.f32.xlu1 %v1005_v18 }
 0x1e7   : > { %v1837_v22 = vpop.f32.mrb[6].mxu1  ;;  %v2445_v23 = vadd.f32 %v2421_v7, %v884_v20 }
 0x1e8   : > { %v887_v24 = vpop.f32.mrb[7].mxu1  ;;  %v1014_v25 = vsel %vm995_vm2, %v2442_v19, -inf  ;;  %v2450_v26 = vadd.f32 %v1837_v22, %v2421_v7 }
 0x1e9   : > { %1015 = vmax.xlane.f32.xlu0 %v1014_v25  ;;  %v1008_v28 = vsel %vm995_vm2, %v2445_v23, -inf  ;;  %v2457_v29 = vadd.f32 %v2421_v7, %v887_v24 }
 0x1ea   : > { %1000 = vmax.xlane.f32.xlu1 %v999_v27  ;;  %v1017_v31 = vsel %vm995_vm2, %v2450_v26, -inf }
 0x1eb   : > { %v1011_v39 = vsel %vm995_vm2, %v2457_v29, -inf }
 0x1ed   : > { %v1840_v30 = vpop.f32.mrb[8].mxu1  ;;  %1009 = vmax.xlane.f32.xlu0 %v1008_v28 }
 0x1ee   : > { %v2462_v32 = vadd.f32 %v1840_v30, %v2421_v7  ;;  %v900_v33 = vpop.f32.mrb[9].mxu1  ;;  %1018 = vmax.xlane.f32.xlu1 %v1017_v31 }
 0x1ef   : > { %v1841_v34 = vpop.f32.mrb[10].mxu1  ;;  %v2465_v35 = vadd.f32 %v2421_v7, %v900_v33 }
 0x1f0   : > { %v903_v36 = vpop.f32.mrb[11].mxu1  ;;  %v1026_v37 = vsel %vm995_vm2, %v2462_v32, -inf  ;;  %v2470_v38 = vadd.f32 %v1841_v34, %v2421_v7 }
 0x1f1   : > { %1027 = vmax.xlane.f32.xlu0 %v1026_v37  ;;  %v1020_v40 = vsel %vm995_vm2, %v2465_v35, -inf  ;;  %v2477_v41 = vadd.f32 %v2421_v7, %v903_v36 }
 0x1f2   : > { %1012 = vmax.xlane.f32.xlu1 %v1011_v39  ;;  %v1029_v43 = vsel %vm995_vm2, %v2470_v38, -inf }
 0x1f3   : > { %v1023_v49 = vsel %vm995_vm2, %v2477_v41, -inf }
 0x1f5   : > { %v1844_v42 = vpop.f32.mrb[12].mxu1  ;;  %1021 = vmax.xlane.f32.xlu0 %v1020_v40 }
 0x1f6   : > { %v2482_v44 = vadd.f32 %v1844_v42, %v2421_v7  ;;  %v916_v45 = vpop.f32.mrb[13].mxu1  ;;  %1030 = vmax.xlane.f32.xlu1 %v1029_v43 }
 0x1f7   : > { %v1845_v46 = vpop.f32.mrb[14].mxu1  ;;  %v2557_v39 = vadd.f32 %v2421_v7, %v916_v45 }
 0x1f8   : > { %v2485_v47 = vadd.f32 %v1845_v46, %v2421_v7  ;;  %v919_v48 = vpop.f32.mrb[15].mxu1 }
 0x1f9   : > { %v2546_v30 = vadd.f32 %v2421_v7, %v919_v48 }
 0x1fa   : > { %1024 = vmax.xlane.f32.xlu1 %v1023_v49  ;;  %v1032_v49 = vsel %vm995_vm2, %v2557_v39, -inf }
 0x1fb   : > { %v1035_v48 = vsel %vm995_vm2, %v2546_v30, -inf }
 0x1fd   : > { %v1848_v50 = vpop.f32.mrb[16].mxu1 }
 0x1fe   : > { %v2490_v51 = vadd.f32 %v1848_v50, %v2421_v7  ;;  %v932_v52 = vpop.f32.mrb[17].mxu1 }
 0x1ff   : > { %v1849_v53 = vpop.f32.mrb[18].mxu1  ;;  %v2493_v54 = vadd.f32 %v2421_v7, %v932_v52 }
 0x200   : > { %v2496_v55 = vadd.f32 %v1849_v53, %v2421_v7  ;;  %v935_v56 = vpop.f32.mrb[19].mxu1  ;;  %v1050_v57 = vsel %vm995_vm2, %v2490_v51, -inf  ;;  %v1041_v53 = vsel %vm995_vm2, %v2485_v47, -inf }
 0x201   : > { %1051 = vmax.xlane.f32.xlu0 %v1050_v57  ;;  %v2503_v59 = vadd.f32 %v2421_v7, %v935_v56  ;;  %v1044_v60 = vsel %vm995_vm2, %v2493_v54, -inf  ;;  %v1038_v56 = vsel %vm995_vm2, %v2482_v44, -inf }
 0x202   : > { %v1053_v58 = vsel %vm995_vm2, %v2496_v55, -inf }
 0x203   : > { %1054 = vmax.xlane.f32.xlu1 %v1053_v58  ;;  %v1047_v2 = vsel %vm995_vm2, %v2503_v59, -inf }
 0x205   : > { %v1852_v61 = vpop.f32.mrb[20].mxu1  ;;  %1045 = vmax.xlane.f32.xlu0 %v1044_v60 }
 0x206   : > { %v948_v62 = vpop.f32.mrb[21].mxu1  ;;  %v2508_v0 = vadd.f32 %v1852_v61, %v2421_v7 }
 0x207   : > { %v1853_v63 = vpop.f32.mrb[22].mxu1  ;;  %v2521_v6 = vadd.f32 %v2421_v7, %v948_v62 }
 0x208   : > { %v2511_v1 = vadd.f32 %v1853_v63, %v2421_v7  ;;  %v951_v3 = vpop.f32.mrb[23].mxu1  ;;  %v1062_v8 = vsel %vm995_vm2, %v2508_v0, -inf }
 0x209   : > { %1048 = vmax.xlane.f32.xlu0 %v1047_v2  ;;  %v2516_v4 = vadd.f32 %v2421_v7, %v951_v3  ;;  %v1056_v18 = vsel %vm995_vm2, %v2521_v6, -inf }
 0x20a   : > { %v1065_v5 = vsel %vm995_vm2, %v2511_v1, -inf }
 0x20b   : > { %1066 = vmax.xlane.f32.xlu1 %v1065_v5  ;;  %v1059_v12 = vsel %vm995_vm2, %v2516_v4, -inf }
 0x20d   : > { %v1856_v10 = vpop.f32.mrb[24].mxu1  ;;  %1063 = vmax.xlane.f32.xlu0 %v1062_v8 }
 0x20e   : > { %v964_v11 = vpop.f32.mrb[25].mxu1  ;;  %v2528_v15 = vadd.f32 %v1856_v10, %v2421_v7 }
 0x20f   : > { %v1857_v13 = vpop.f32.mrb[26].mxu1  ;;  %1060 = vmax.xlane.f32.xlu1 %v1059_v12  ;;  %v2541_v25 = vadd.f32 %v2421_v7, %v964_v11 }
 0x210   : > { %v2531_v17 = vadd.f32 %v1857_v13, %v2421_v7  ;;  %v967_v20 = vpop.f32.mrb[27].mxu1  ;;  %v1074_v27 = vsel %vm995_vm2, %v2528_v15, -inf }
 0x211   : > { %1057 = vmax.xlane.f32.xlu0 %v1056_v18  ;;  %v2536_v22 = vadd.f32 %v2421_v7, %v967_v20  ;;  %v1068_v40 = vsel %vm995_vm2, %v2541_v25, -inf }
 0x212   : > { %v1077_v24 = vsel %vm995_vm2, %v2531_v17, -inf }
 0x213   : > { %1078 = vmax.xlane.f32.xlu1 %v1077_v24  ;;  %v1071_v31 = vsel %vm995_vm2, %v2536_v22, -inf }
 0x215   : > { %1075 = vmax.xlane.f32.xlu0 %v1074_v27  ;;  %v1860_v28 = vpop.f32.mrb[28].mxu1 }
 0x216   : > { %v2551_v33 = vadd.f32 %v1860_v28, %v2421_v7  ;;  %v980_v34 = vpop.f32.mrb[29].mxu1 }
 0x217   : > { %1072 = vmax.xlane.f32.xlu1 %v1071_v31  ;;  %v2554_v36 = vadd.f32 %v2421_v7, %v980_v34  ;;  %v1861_v37 = vpop.f32.mrb[30].mxu1 }
 0x218   : > { %v2562_v42 = vadd.f32 %v1861_v37, %v2421_v7  ;;  %v983_v43 = vpop.f32.mrb[31].mxu1  ;;  %v1086_v52 = vsel %vm995_vm2, %v2551_v33, -inf }
 0x219   : > { %1069 = vmax.xlane.f32.xlu0 %v1068_v40  ;;  %v2565_v46 = vadd.f32 %v2421_v7, %v983_v43  ;;  %v1080_v50 = vsel %vm995_vm2, %v2554_v36, -inf }
 0x21a   : > { %v1089_v7 = vsel %vm995_vm2, %v2562_v42, -inf }
 0x21b   : > { %1036 = vmax.xlane.f32.xlu1 %v1035_v48  ;;  %v1083_v45 = vsel %vm995_vm2, %v2565_v46, -inf }
 0x21d   : > { %1033 = vmax.xlane.f32.xlu0 %v1032_v49 }
 0x21f   : > { %1084 = vmax.xlane.f32.xlu1 %v1083_v45 }
 0x221   : > { %1081 = vmax.xlane.f32.xlu0 %v1080_v50 }
 0x223   : > { %1090 = vmax.xlane.f32.xlu1 %v1089_v7 }
 0x225   : > { %1087 = vmax.xlane.f32.xlu0 %v1086_v52 }
 0x227   : > { %1042 = vmax.xlane.f32.xlu1 %v1041_v53 }
 0x229   : > { %1039 = vmax.xlane.f32.xlu0 %v1038_v56 }
 0x26e   : > { %v1004_v57 = vpop.xlane.xlu0 %1003 }
 0x26f   : > { %v1094_v58 = vsub.f32 %v2424_v9, %v1004_v57  ;;  %v998_v60 = vpop.xlane.xlu1 %997 }
 0x270   : > { %v1092_v61 = vsub.f32 %v2427_v21, %v998_v60 }
 0x271   : > { %v1128_v62 = vmul.f32 1.442695, %v1094_v58 }
 0x272   : > { %v1124_v63 = vmul.f32 1.442695, %v1092_v61 }
 0x273   : > { %1957 = vpow2.f32 %v1128_v62  ;;  %v1007_v2 = vpop.xlane.xlu1 %1006 }
 0x274   : > { %v1095_v3 = vsub.f32 %v2432_v14, %v1007_v2  ;;  %1959 = vpow2.f32 %v1124_v63 }
 0x276   : > { %v1130_v5 = vmul.f32 1.442695, %v1095_v3  ;;  %v1016_v8 = vpop.xlane.xlu0 %1015 }
 0x277   : > { %v1098_v10 = vsub.f32 %v2442_v19, %v1016_v8  ;;  %v1001_v11 = vpop.xlane.xlu1 %1000 }
 0x278   : > { %1961 = vpow2.f32 %v1130_v5  ;;  %v1093_v12 = vsub.f32 %v2437_v16, %v1001_v11 }
 0x279   : > { %v1136_v13 = vmul.f32 1.442695, %v1098_v10 }
 0x27a   : > { %v1126_v9 = vmul.f32 1.442695, %v1093_v12  ;;  %v1010_v18 = vpop.xlane.xlu0 %1009 }
 0x27b   : > { %1963 = vpow2.f32 %v1136_v13  ;;  %v1096_v21 = vsub.f32 %v2445_v23, %v1010_v18  ;;  %v1019_v20 = vpop.xlane.xlu1 %1018 }
 0x27c   : > { %1965 = vpow2.f32 %v1126_v9  ;;  %v1099_v24 = vsub.f32 %v2450_v26, %v1019_v20 }
 0x27d   : > { %v2590_v14 = vpop.eup %1957  ;;  %v1132_v27 = vmul.f32 1.442695, %v1096_v21 }
 0x27e   : > { %v1138_v28 = vmul.f32 1.442695, %v1099_v24  ;;  %v1028_v31 = vpop.xlane.xlu0 %1027  ;;  %v1194_v19 = vsel %vm995_vm2, %v2590_v14, 0.0  ;;  %v2594_v34 = vpop.eup %1959 }
 0x27f   : > { %1967 = vpow2.f32 %v1132_v27  ;;  %v1102_v16 = vsub.f32 %v2462_v32, %v1028_v31  ;;  %1195 = vadd.xlane.f32.xlu0 %v1194_v19  ;;  %v1013_v37 = vpop.xlane.xlu1 %1012  ;;  %v1188_v49 = vsel %vm995_vm2, %v2594_v34, 0.0 }
 0x280   : > { %1969 = vpow2.f32 %v1138_v28  ;;  %v1097_v23 = vsub.f32 %v2457_v29, %v1013_v37 }
 0x281   : > { %v1144_v40 = vmul.f32 1.442695, %v1102_v16 }
 0x282   : > { %v2598_v26 = vpop.eup %1961  ;;  %v1134_v43 = vmul.f32 1.442695, %v1097_v23  ;;  %v1022_v48 = vpop.xlane.xlu0 %1021 }
 0x283   : > { %1971 = vpow2.f32 %v1144_v40  ;;  %v1100_v45 = vsub.f32 %v2465_v35, %v1022_v48  ;;  %1189 = vadd.xlane.f32.xlu0 %v1188_v49  ;;  %v1031_v50 = vpop.xlane.xlu1 %1030  ;;  %v1197_v32 = vsel %vm995_vm2, %v2598_v26, 0.0 }
 0x284   : > { %1973 = vpow2.f32 %v1134_v43  ;;  %v1103_v7 = vsub.f32 %v2470_v38, %v1031_v50  ;;  %1198 = vadd.xlane.f32.xlu1 %v1197_v32 }
 0x285   : > { %v2606_v29 = vpop.eup %1963  ;;  %v1140_v52 = vmul.f32 1.442695, %v1100_v45 }
 0x286   : > { %v2608_v53 = vpop.eup %1965  ;;  %v1146_v56 = vmul.f32 1.442695, %v1103_v7  ;;  %v1206_v57 = vsel %vm995_vm2, %v2606_v29, 0.0 }
 0x287   : > { %1975 = vpow2.f32 %v1140_v52  ;;  %1207 = vadd.xlane.f32.xlu0 %v1206_v57  ;;  %v1025_v35 = vpop.xlane.xlu1 %1024  ;;  %v1191_v58 = vsel %vm995_vm2, %v2608_v53, 0.0 }
 0x288   : > { %1977 = vpow2.f32 %v1146_v56  ;;  %v1101_v60 = vsub.f32 %v2477_v41, %v1025_v35  ;;  %1192 = vadd.xlane.f32.xlu1 %v1191_v58 }
 0x289   : > { %v2615_v38 = vpop.eup %1967 }
 0x28a   : > { %v2617_v61 = vpop.eup %1969  ;;  %v1142_v62 = vmul.f32 1.442695, %v1101_v60  ;;  %v1200_v63 = vsel %vm995_vm2, %v2615_v38, 0.0 }
 0x28b   : > { %1201 = vadd.xlane.f32.xlu0 %v1200_v63  ;;  %v1209_v2 = vsel %vm995_vm2, %v2617_v61, 0.0 }
 0x28c   : > { %1979 = vpow2.f32 %v1142_v62  ;;  %1210 = vadd.xlane.f32.xlu1 %v1209_v2 }
 0x28d   : > { %v2623_v3 = vpop.eup %1971 }
 0x28e   : > { %v2625_v5 = vpop.eup %1973  ;;  %v1052_v41 = vpop.xlane.xlu0 %1051  ;;  %v1218_v8 = vsel %vm995_vm2, %v2623_v3, 0.0 }
 0x28f   : > { %v1110_v10 = vsub.f32 %v2490_v51, %v1052_v41  ;;  %1219 = vadd.xlane.f32.xlu0 %v1218_v8  ;;  %v1203_v11 = vsel %vm995_vm2, %v2625_v5, 0.0 }
 0x290   : > { %1204 = vadd.xlane.f32.xlu1 %v1203_v11  ;;  %v1055_v12 = vpop.xlane.xlu1 %1054 }
 0x291   : > { %v2632_v13 = vpop.eup %1975  ;;  %v1160_v9 = vmul.f32 1.442695, %v1110_v10  ;;  %v1111_v18 = vsub.f32 %v2496_v55, %v1055_v12 }
 0x292   : > { %v2635_v21 = vpop.eup %1977  ;;  %v1046_v20 = vpop.xlane.xlu0 %1045  ;;  %v1212_v24 = vsel %vm995_vm2, %v2632_v13, 0.0 }
 0x293   : > { %1981 = vpow2.f32 %v1160_v9  ;;  %v1162_v27 = vmul.f32 1.442695, %v1111_v18  ;;  %v1108_v51 = vsub.f32 %v2493_v54, %v1046_v20  ;;  %1213 = vadd.xlane.f32.xlu0 %v1212_v24  ;;  %v1221_v28 = vsel %vm995_vm2, %v2635_v21, 0.0 }
 0x294   : > { %1222 = vadd.xlane.f32.xlu1 %v1221_v28 }
 0x295   : > { %1983 = vpow2.f32 %v1162_v27  ;;  %v1156_v31 = vmul.f32 1.442695, %v1108_v51 }
 0x296   : > { %v2642_v19 = vpop.eup %1979  ;;  %v1049_v55 = vpop.xlane.xlu0 %1048 }
 0x297   : > { %1985 = vpow2.f32 %v1156_v31  ;;  %v1109_v16 = vsub.f32 %v2503_v59, %v1049_v55  ;;  %v1215_v37 = vsel %vm995_vm2, %v2642_v19, 0.0 }
 0x298   : > { %1216 = vadd.xlane.f32.xlu1 %v1215_v37  ;;  %v1067_v23 = vpop.xlane.xlu1 %1066 }
 0x299   : > { %v1158_v40 = vmul.f32 1.442695, %v1109_v16  ;;  %v1115_v54 = vsub.f32 %v2511_v1, %v1067_v23 }
 0x29a   : > { %v1064_v43 = vpop.xlane.xlu0 %1063 }
 0x29b   : > { %1987 = vpow2.f32 %v1158_v40  ;;  %v1170_v48 = vmul.f32 1.442695, %v1115_v54  ;;  %v1114_v49 = vsub.f32 %v2508_v0, %v1064_v43 }
 0x29c   : > { %v1061_v45 = vpop.xlane.xlu1 %1060 }
 0x29d   : > { %v2649_v50 = vpop.eup %1981  ;;  %1989 = vpow2.f32 %v1170_v48  ;;  %v1168_v32 = vmul.f32 1.442695, %v1114_v49  ;;  %v1113_v59 = vsub.f32 %v2516_v4, %v1061_v45 }
 0x29e   : > { %v1058_v7 = vpop.xlane.xlu0 %1057  ;;  %v1242_v52 = vsel %vm995_vm2, %v2649_v50, 0.0 }
 0x29f   : > { %v2654_v56 = vpop.eup %1983  ;;  %1991 = vpow2.f32 %v1168_v32  ;;  %v1166_v1 = vmul.f32 1.442695, %v1113_v59  ;;  %v1112_v57 = vsub.f32 %v2521_v6, %v1058_v7  ;;  %1243 = vadd.xlane.f32.xlu0 %v1242_v52 }
 0x2a0   : > { %v1079_v35 = vpop.xlane.xlu1 %1078  ;;  %v1245_v0 = vsel %vm995_vm2, %v2654_v56, 0.0 }
 0x2a1   : > { %v2659_v58 = vpop.eup %1985  ;;  %1993 = vpow2.f32 %v1166_v1  ;;  %v1164_v60 = vmul.f32 1.442695, %v1112_v57  ;;  %v1119_v4 = vsub.f32 %v2531_v17, %v1079_v35  ;;  %1246 = vadd.xlane.f32.xlu1 %v1245_v0 }
 0x2a2   : > { %v1076_v62 = vpop.xlane.xlu0 %1075  ;;  %v1236_v63 = vsel %vm995_vm2, %v2659_v58, 0.0 }
 0x2a3   : > { %1995 = vpow2.f32 %v1164_v60  ;;  %v1178_v2 = vmul.f32 1.442695, %v1119_v4  ;;  %v1118_v6 = vsub.f32 %v2528_v15, %v1076_v62  ;;  %1237 = vadd.xlane.f32.xlu0 %v1236_v63 }
 0x2a4   : > { %v1073_v41 = vpop.xlane.xlu1 %1072 }
 0x2a5   : > { %v2665_v8 = vpop.eup %1987  ;;  %1997 = vpow2.f32 %v1178_v2  ;;  %v1176_v10 = vmul.f32 1.442695, %v1118_v6  ;;  %v1117_v11 = vsub.f32 %v2536_v22, %v1073_v41 }
 0x2a6   : > { %v1070_v12 = vpop.xlane.xlu0 %1069  ;;  %v1239_v17 = vsel %vm995_vm2, %v2665_v8, 0.0 }
 0x2a7   : > { %v2670_v9 = vpop.eup %1989  ;;  %1999 = vpow2.f32 %v1176_v10  ;;  %v1174_v18 = vmul.f32 1.442695, %v1117_v11  ;;  %v1116_v20 = vsub.f32 %v2541_v25, %v1070_v12  ;;  %1240 = vadd.xlane.f32.xlu1 %v1239_v17 }
 0x2a8   : > { %v1037_v15 = vpop.xlane.xlu1 %1036  ;;  %v1257_v31 = vsel %vm995_vm2, %v2670_v9, 0.0 }
 0x2a9   : > { %v2673_v24 = vpop.eup %1991  ;;  %2001 = vpow2.f32 %v1174_v18  ;;  %v1172_v27 = vmul.f32 1.442695, %v1116_v20  ;;  %v1105_v51 = vsub.f32 %v2546_v30, %v1037_v15 }
 0x2aa   : > { %v1034_v28 = vpop.xlane.xlu0 %1033  ;;  %v1254_v22 = vsel %vm995_vm2, %v2673_v24, 0.0 }
 0x2ab   : > { %v2680_v55 = vpop.eup %1993  ;;  %2003 = vpow2.f32 %v1172_v27  ;;  %v1150_v16 = vmul.f32 1.442695, %v1105_v51  ;;  %v1104_v25 = vsub.f32 %v2557_v39, %v1034_v28  ;;  %1255 = vadd.xlane.f32.xlu0 %v1254_v22  ;;  %1258 = vadd.xlane.f32.xlu1 %v1257_v31 }
 0x2ac   : > { %v1085_v37 = vpop.xlane.xlu1 %1084  ;;  %v1251_v48 = vsel %vm995_vm2, %v2680_v55, 0.0 }
 0x2ad   : > { %v2683_v23 = vpop.eup %1995  ;;  %2005 = vpow2.f32 %v1150_v16  ;;  %v1148_v30 = vmul.f32 1.442695, %v1104_v25  ;;  %v1121_v40 = vsub.f32 %v2565_v46, %v1085_v37 }
 0x2ae   : > { %v1082_v54 = vpop.xlane.xlu0 %1081  ;;  %v1248_v43 = vsel %vm995_vm2, %v2683_v23, 0.0 }
 0x2af   : > { %v2690_v49 = vpop.eup %1997  ;;  %2007 = vpow2.f32 %v1148_v30  ;;  %v1182_v39 = vmul.f32 1.442695, %v1121_v40  ;;  %v1120_v45 = vsub.f32 %v2554_v36, %v1082_v54  ;;  %1249 = vadd.xlane.f32.xlu0 %v1248_v43  ;;  %1252 = vadd.xlane.f32.xlu1 %v1251_v48  ;;  %v1381_v30 = vlaneseq  ;;  %v1437_v43 = vld [vmem:[%s348_s18] sm:$0x3]  ;;  %s1731_s18 = sshll.u32 %s2167_s28, 8  ;;  %s3055_s28 = sand.u32 1, %s2155_s25  }
 0x2b0   : > { %v1091_v32 = vpop.xlane.xlu1 %1090  ;;  %v1269_v57 = vsel %vm995_vm2, %v2690_v49, 0.0  ;;  %s2972_s11 = scalar_lea.hbm %s3041_s7, %s1731_s18  ;;  %s2982_s27 = scalar_lea.sflag [#allocation3], %s3055_s28 }
 0x2b1   : > { %v2693_v59 = vpop.eup %1999  ;;  %2009 = vpow2.f32 %v1182_v39  ;;  %v1180_v46 = vmul.f32 1.442695, %v1120_v45  ;;  %v1123_v7 = vsub.f32 %v2562_v42, %v1091_v32  ;;  %v1435_v40 = vshrl.u32 %v1381_v30, 7 }
 0x2b2   : > { %v1088_v52 = vpop.xlane.xlu0 %1087  ;;  %v1266_v1 = vsel %vm995_vm2, %v2693_v59, 0.0 }
 0x2b3   : > { %v2700_v35 = vpop.eup %2001  ;;  %2011 = vpow2.f32 %v1180_v46  ;;  %v1186_v36 = vmul.f32 1.442695, %v1123_v7  ;;  %v1122_v0 = vsub.f32 %v2551_v33, %v1088_v52  ;;  %1267 = vadd.xlane.f32.xlu0 %v1266_v1  ;;  %1270 = vadd.xlane.f32.xlu1 %v1269_v57  ;;  %v1444_v54 = vsub.s32 1, %v1435_v40 }
 0x2b4   : > { %v1043_v60 = vpop.xlane.xlu1 %1042  ;;  %v1263_v6 = vsel %vm995_vm2, %v2700_v35, 0.0  ;;  %v1440_v48 = vsub.s32 0, %v1435_v40  ;;  %v1436_v39 = vadd.s32 8, %v1435_v40  ;;  %v2182_v46 = vmov 1.0|1.0  }
 0x2b5   : > { %v2703_v4 = vpop.eup %2003  ;;  %2013 = vpow2.f32 %v1186_v36  ;;  %v1184_v42 = vmul.f32 1.442695, %v1122_v0  ;;  %v1107_v62 = vsub.f32 %v2485_v47, %v1043_v60  ;;  %v1445_v45 = vrot.slane %v1437_v43, %v1444_v54 }
 0x2b6   : > { %v1040_v63 = vpop.xlane.xlu0 %1039  ;;  %v1260_v2 = vsel %vm995_vm2, %v2703_v4, 0.0  ;;  %v1441_v32 = vrot.slane %v1437_v43, %v1440_v48 }
 0x2b7   : > { %v2710_v41 = vpop.eup %2005  ;;  %2015 = vpow2.f32 %v1184_v42  ;;  %v1154_v33 = vmul.f32 1.442695, %v1107_v62  ;;  %v1106_v10 = vsub.f32 %v2482_v44, %v1040_v63  ;;  %1261 = vadd.xlane.f32.xlu0 %v1260_v2  ;;  %1264 = vadd.xlane.f32.xlu1 %v1263_v6  ;;  %vm1447_vm3 = vcmp.eq.s32.totalorder %v1435_v40, %v1445_v45 }
 0x2b8   : > { %v1227_v17 = vsel %vm995_vm2, %v2710_v41, 0.0  ;;  %vm1449_vm4 = vcmp.eq.s32.totalorder %v1436_v39, %v1445_v45  ;;  %vm1448_vm5 = vcmp.eq.s32.totalorder %v1436_v39, %v1441_v32  ;;  %vm1446_vm7 = vcmp.eq.s32.totalorder %v1435_v40, %v1441_v32 }
 0x2b9   : > { %v2713_v11 = vpop.eup %2007  ;;  %2017 = vpow2.f32 %v1154_v33  ;;  %v1152_v12 = vmul.f32 1.442695, %v1106_v10  ;;  %vm1722_vm6 = vmpackc.low %vm1449_vm4, %vm1447_vm3 }
 0x2ba   : > { %v1224_v47 = vsel %vm995_vm2, %v2713_v11, 0.0  ;;  %1723 = vmatprep.mubr.msk.bf16.mxu0 %vm1722_vm6, %v2182_v46  ;;  %vm2750_vm8 = vmpackc.low %vm1448_vm5, %vm1446_vm7 }
 0x2bb   : > { %v2719_v18 = vpop.eup %2009  ;;  %2019 = vpow2.f32 %v1152_v12  ;;  %1225 = vadd.xlane.f32.xlu0 %v1224_v47  ;;  %1228 = vadd.xlane.f32.xlu1 %v1227_v17 }
 0x2bc   : > { %v1275_v15 = vsel %vm995_vm2, %v2719_v18, 0.0 }
 0x2bd   : > { %v2721_v20 = vpop.eup %2011 }
 0x2be   : > { %v1272_v44 = vsel %vm995_vm2, %v2721_v20, 0.0 }
 0x2bf   : > { %v2727_v27 = vpop.eup %2013  ;;  %1273 = vadd.xlane.f32.xlu0 %v1272_v44  ;;  %1276 = vadd.xlane.f32.xlu1 %v1275_v15 }
 0x2c0   : > { %v1281_v22 = vsel %vm995_vm2, %v2727_v27, 0.0 }
 0x2c1   : > { %v2729_v51 = vpop.eup %2015 }
 0x2c2   : > { %v1278_v28 = vsel %vm995_vm2, %v2729_v51, 0.0 }
 0x2c3   : > { %v2735_v31 = vpop.eup %2017  ;;  %1279 = vadd.xlane.f32.xlu0 %v1278_v28  ;;  %1282 = vadd.xlane.f32.xlu1 %v1281_v22 }
 0x2c4   : > { %v1233_v37 = vsel %vm995_vm2, %v2735_v31, 0.0 }
 0x2c5   : > { %v2737_v16 = vpop.eup %2019 }
 0x2c6   : > { %v1230_v25 = vsel %vm995_vm2, %v2737_v16, 0.0 }
 0x2c7   : > { %1231 = vadd.xlane.f32.xlu0 %v1230_v25  ;;  %1234 = vadd.xlane.f32.xlu1 %v1233_v37 }
 0x30c   : > { %v1196_v52 = vpop.xlane.xlu0 %1195 }
 0x30d   : > { %2021 = vrcp.f32 %v1196_v52 }
 0x310   : > { %v1190_v1 = vpop.xlane.xlu0 %1189 }
 0x311   : > { %2023 = vrcp.f32 %v1190_v1  ;;  %v1199_v57 = vpop.xlane.xlu1 %1198 }
 0x312   : > { %2025 = vrcp.f32 %v1199_v57 }
 0x314   : > { %v1208_v36 = vpop.xlane.xlu0 %1207 }
 0x315   : > { %2027 = vrcp.f32 %v1208_v36  ;;  %v1193_v0 = vpop.xlane.xlu1 %1192 }
 0x316   : > { %2029 = vrcp.f32 %v1193_v0 }
 0x317   : > { %v2022_v60 = vpop.eup %2021 }
 0x318   : > { %v1202_v42 = vpop.xlane.xlu0 %1201  ;;  %v2755_v62 = vmul.f32 %v2022_v60, %v2590_v14 }
 0x319   : > { %2031 = vrcp.f32 %v1202_v42  ;;  %v1211_v63 = vpop.xlane.xlu1 %1210 }
 0x31a   : > { %2033 = vrcp.f32 %v1211_v63  ;;  %1351 = vst.msk [vmem:[%s2314_s21 + $0x10] sm:$0xff] %vm1348_vm9, %v2755_v62 }
 0x31b   : > { %v2024_v2 = vpop.eup %2023 }
 0x31c   : > { %v2026_v6 = vpop.eup %2025  ;;  %v1220_v33 = vpop.xlane.xlu0 %1219  ;;  %v2761_v10 = vmul.f32 %v2024_v2, %v2594_v34 }
 0x31d   : > { %2035 = vrcp.f32 %v1220_v33  ;;  %v1205_v12 = vpop.xlane.xlu1 %1204  ;;  %v2764_v47 = vmul.f32 %v2026_v6, %v2598_v26  ;;  %v2829_v6 = vand.u32 127, %v1381_v30 }
 0x31e   : > { %2037 = vrcp.f32 %v1205_v12  ;;  %1349 = vst.msk [vmem:[%s2314_s21] sm:$0xff] %vm1348_vm9, %v2761_v10 }
 0x31f   : > { %v2028_v14 = vpop.eup %2027  ;;  %1352 = vst.msk [vmem:[%s2314_s21 + $0x18] sm:$0xff] %vm1348_vm9, %v2764_v47  ;;  %vm1383_vm10 = vcmp.eq.s32.totalorder %v2829_v6, 20 }
 0x320   : > { %v2030_v17 = vpop.eup %2029  ;;  %v1214_v44 = vpop.xlane.xlu0 %1213  ;;  %v2773_v34 = vmul.f32 %v2028_v14, %v2606_v29 }
 0x321   : > { %2039 = vrcp.f32 %v1214_v44  ;;  %v1223_v15 = vpop.xlane.xlu1 %1222  ;;  %v1317_v26 = vmul.f32 %v2030_v17, %v2608_v53 }
 0x322   : > { %2041 = vrcp.f32 %v1223_v15  ;;  %1355 = vst.msk [vmem:[%s2314_s21 + $0x30] sm:$0xff] %vm1348_vm9, %v2773_v34  ;;  %v1386_v15 = vsel %vm1383_vm10, 1.0, %v2761_v10 }
 0x323   : > { %v2032_v28 = vpop.eup %2031  ;;  %1350 = vst.msk [vmem:[%s2314_s21 + $0x8] sm:$0xff] %vm1348_vm9, %v1317_v26 }
 0x324   : > { %v2034_v22 = vpop.eup %2033  ;;  %v2782_v25 = vmul.f32 %v2032_v28, %v2615_v38 }
 0x325   : > { %v1217_v37 = vpop.xlane.xlu1 %1216  ;;  %v2785_v29 = vmul.f32 %v2034_v22, %v2617_v61 }
 0x326   : > { %2043 = vrcp.f32 %v1217_v37  ;;  %1353 = vst.msk [vmem:[%s2314_s21 + $0x20] sm:$0xff] %vm1348_vm9, %v2782_v25 }
 0x327   : > { %v2036_v53 = vpop.eup %2035  ;;  %1356 = vst.msk [vmem:[%s2314_s21 + $0x38] sm:$0xff] %vm1348_vm9, %v2785_v29 }
 0x328   : > { %v2038_v40 = vpop.eup %2037  ;;  %v2794_v54 = vmul.f32 %v2036_v53, %v2623_v3 }
 0x329   : > { %v2797_v38 = vmul.f32 %v2038_v40, %v2625_v5 }
 0x32a   : > { %1359 = vst.msk [vmem:[%s2314_s21 + $0x50] sm:$0xff] %vm1348_vm9, %v2794_v54 }
 0x32b   : > { %v2040_v61 = vpop.eup %2039  ;;  %1354 = vst.msk [vmem:[%s2314_s21 + $0x28] sm:$0xff] %vm1348_vm9, %v2797_v38 }
 0x32c   : > { %v2042_v43 = vpop.eup %2041  ;;  %v1244_v48 = vpop.xlane.xlu0 %1243  ;;  %v2806_v39 = vmul.f32 %v2040_v61, %v2632_v13 }
 0x32d   : > { %2045 = vrcp.f32 %v1244_v48  ;;  %v2809_v3 = vmul.f32 %v2042_v43, %v2635_v21  ;;  %v1389_v43 = vsel %vm1383_vm10, 1.0, %v2764_v47 }
 0x32e   : > { %v1247_v45 = vpop.xlane.xlu1 %1246  ;;  %1357 = vst.msk [vmem:[%s2314_s21 + $0x40] sm:$0xff] %vm1348_vm9, %v2806_v39 }
 0x32f   : > { %2047 = vrcp.f32 %v1247_v45  ;;  %1360 = vst.msk [vmem:[%s2314_s21 + $0x58] sm:$0xff] %vm1348_vm9, %v2809_v3 }
 0x330   : > { %v2044_v5 = vpop.eup %2043  ;;  %v1238_v32 = vpop.xlane.xlu0 %1237 }
 0x331   : > { %2049 = vrcp.f32 %v1238_v32  ;;  %v2818_v52 = vmul.f32 %v2044_v5, %v2642_v19 }
 0x333   : > { %1358 = vst.msk [vmem:[%s2314_s21 + $0x48] sm:$0xff] %vm1348_vm9, %v2818_v52 }
 0x334   : > { %v1241_v13 = vpop.xlane.xlu1 %1240 }
 0x335   : > { %2051 = vrcp.f32 %v1241_v13 }
 0x337   : > { %v2046_v21 = vpop.eup %2045 }
 0x338   : > { %v1256_v1 = vpop.xlane.xlu0 %1255  ;;  %v1259_v57 = vpop.xlane.xlu1 %1258  ;;  %v1334_v36 = vmul.f32 %v2046_v21, %v2649_v50 }
 0x339   : > { %v2048_v0 = vpop.eup %2047  ;;  %2053 = vrcp.f32 %v1256_v1 }
 0x33a   : > { %2055 = vrcp.f32 %v1259_v57  ;;  %v1335_v60 = vmul.f32 %v2048_v0, %v2654_v56  ;;  %1367 = vst.msk [vmem:[%s2314_s21 + $0x90] sm:$0xff] %vm1348_vm9, %v1334_v36  ;;  %v1404_v53 = vsel %vm1383_vm10, 1.0, %v1334_v36 }
 0x33b   : > { %v2050_v19 = vpop.eup %2049 }
 0x33c   : > { %v1250_v42 = vpop.xlane.xlu0 %1249  ;;  %v1253_v63 = vpop.xlane.xlu1 %1252  ;;  %v1332_v2 = vmul.f32 %v2050_v19, %v2659_v58  ;;  %1368 = vst.msk [vmem:[%s2314_s21 + $0x98] sm:$0xff] %vm1348_vm9, %v1335_v60  ;;  %v1387_v58 = vsel %vm1383_vm10, 1.0, %v1317_v26  ;;  %v1405_v17 = vsel %vm1383_vm10, 1.0, %v1335_v60 }
 0x33d   : > { %2057 = vrcp.f32 %v1250_v42  ;;  %v1418_v37 = vpack.c.bf16 %v1387_v58, %v1386_v15  ;;  %v1427_v61 = vpack.c.bf16 %v1405_v17, %v1404_v53  ;;  %v1395_v17 = vsel %vm1383_vm10, 1.0, %v2818_v52 }
 0x33e   : > { %2059 = vrcp.f32 %v1253_v63  ;;  %1365 = vst.msk [vmem:[%s2314_s21 + $0x80] sm:$0xff] %vm1348_vm9, %v1332_v2  ;;  %v1402_v30 = vsel %vm1383_vm10, 1.0, %v1332_v2  ;;  %v1394_v52 = vsel %vm1383_vm10, 1.0, %v2806_v39 }
 0x33f   : > { %v2052_v50 = vpop.eup %2051 }
 0x340   : > { %v1268_v33 = vpop.xlane.xlu0 %1267  ;;  %v1271_v56 = vpop.xlane.xlu1 %1270  ;;  %v1333_v12 = vmul.f32 %v2052_v50, %v2665_v8 }
 0x341   : > { %2061 = vrcp.f32 %v1268_v33  ;;  %v1393_v33 = vsel %vm1383_vm10, 1.0, %v2785_v29 }
 0x342   : > { %2063 = vrcp.f32 %v1271_v56  ;;  %1366 = vst.msk [vmem:[%s2314_s21 + $0x88] sm:$0xff] %vm1348_vm9, %v1333_v12  ;;  %v1403_v14 = vsel %vm1383_vm10, 1.0, %v1333_v12 }
 0x343   : > { %v2054_v44 = vpop.eup %2053  ;;  %v1426_v8 = vpack.c.bf16 %v1403_v14, %v1402_v30 }
 0x344   : > { %v2056_v26 = vpop.eup %2055  ;;  %v1262_v28 = vpop.xlane.xlu0 %1261  ;;  %v1338_v40 = vmul.f32 %v2054_v44, %v2673_v24  ;;  %v1388_v24 = vsel %vm1383_vm10, 1.0, %v2755_v62  ;;  %v1391_v62 = vsel %vm1383_vm10, 1.0, %v2797_v38  ;;  %v1390_v38 = vsel %vm1383_vm10, 1.0, %v2782_v25 }
 0x345   : > { %v1265_v22 = vpop.xlane.xlu1 %1264  ;;  %2065 = vrcp.f32 %v1262_v28  ;;  %1768 = vmatprep.subr.bf16.mxu0 %v1426_v8  ;;  %v1339_v48 = vmul.f32 %v2056_v26, %v2670_v9  ;;  %v1419_v47 = vpack.c.bf16 %v1389_v43, %v1388_v24  ;;  %v1420_v63 = vpack.c.bf16 %v1391_v62, %v1390_v38  ;;  %v1461_v38 = vld [vmem:[%s2316_s17 + $0x8] sm:$0xff] }
 0x346   : > { %2067 = vrcp.f32 %v1265_v22  ;;  %1769 = vmatpush3.bf16.msra.mxu0 %v1418_v37  ;;  %1371 = vst.msk [vmem:[%s2314_s21 + $0xb0] sm:$0xff] %vm1348_vm9, %v1338_v40  ;;  %v1422_v37 = vpack.c.bf16 %v1395_v17, %v1394_v52 }
 0x347   : > { %v2058_v10 = vpop.eup %2057  ;;  %1770 = vmatprep.subr.bf16.mxu0 %v1427_v61  ;;  %1372 = vst.msk [vmem:[%s2314_s21 + $0xb8] sm:$0xff] %vm1348_vm9, %v1339_v48  ;;  %v1409_v57 = vsel %vm1383_vm10, 1.0, %v1339_v48  ;;  %v1397_v61 = vsel %vm1383_vm10, 1.0, %v2809_v3 }
 0x348   : > { %v2060_v45 = vpop.eup %2059  ;;  %v1226_v5 = vpop.xlane.xlu0 %1225  ;;  %v1336_v9 = vmul.f32 %v2058_v10, %v2683_v23 }
 0x349   : > { %v1229_v32 = vpop.xlane.xlu1 %1228  ;;  %2069 = vrcp.f32 %v1226_v5  ;;  %v1337_v13 = vmul.f32 %v2060_v45, %v2680_v55  ;;  %v1408_v55 = vsel %vm1383_vm10, 1.0, %v1338_v40 }
 0x34a   : > { %2071 = vrcp.f32 %v1229_v32  ;;  %1771 = vmatpush3.bf16.msra.mxu0 %v1419_v47  ;;  %1369 = vst.msk [vmem:[%s2314_s21 + $0xa0] sm:$0xff] %vm1348_vm9, %v1336_v9  ;;  %v1406_v21 = vsel %vm1383_vm10, 1.0, %v1336_v9  ;;  %v1429_v50 = vpack.c.bf16 %v1409_v57, %v1408_v55 }
 0x34b   : > { %v2062_v1 = vpop.eup %2061  ;;  %1370 = vst.msk [vmem:[%s2314_s21 + $0xa8] sm:$0xff] %vm1348_vm9, %v1337_v13  ;;  %v1407_v23 = vsel %vm1383_vm10, 1.0, %v1337_v13 }
 0x34c   : > { %v2064_v36 = vpop.eup %2063  ;;  %v1274_v0 = vpop.xlane.xlu0 %1273  ;;  %v1428_v19 = vpack.c.bf16 %v1407_v23, %v1406_v21  ;;  %v1342_v42 = vmul.f32 %v2062_v1, %v2693_v59 }
 0x34d   : > { %v1277_v60 = vpop.xlane.xlu1 %1276  ;;  %2073 = vrcp.f32 %v1274_v0  ;;  %v1343_v2 = vmul.f32 %v2064_v36, %v2690_v49  ;;  %v1392_v49 = vsel %vm1383_vm10, 1.0, %v2773_v34 }
 0x34e   : > { %2075 = vrcp.f32 %v1277_v60  ;;  %1772 = vmatprep.subr.bf16.mxu0 %v1428_v19  ;;  %1375 = vst.msk [vmem:[%s2314_s21 + $0xd0] sm:$0xff] %vm1348_vm9, %v1342_v42  ;;  %v1421_v30 = vpack.c.bf16 %v1393_v33, %v1392_v49 }
 0x34f   : > { %v2066_v56 = vpop.eup %2065  ;;  %1773 = vmatpush3.bf16.msra.mxu0 %v1420_v63  ;;  %1376 = vst.msk [vmem:[%s2314_s21 + $0xd8] sm:$0xff] %vm1348_vm9, %v1343_v2  ;;  %v1413_v34 = vsel %vm1383_vm10, 1.0, %v1343_v2 }
 0x350   : > { %v2068_v59 = vpop.eup %2067  ;;  %1774 = vmatprep.subr.bf16.mxu0 %v1429_v50  ;;  %v1280_v25 = vpop.xlane.xlu0 %1279  ;;  %v1340_v58 = vmul.f32 %v2066_v56, %v2703_v4 }
 0x351   : > { %v1283_v12 = vpop.xlane.xlu1 %1282  ;;  %2077 = vrcp.f32 %v1280_v25  ;;  %v1341_v29 = vmul.f32 %v2068_v59, %v2700_v35  ;;  %v1412_v35 = vsel %vm1383_vm10, 1.0, %v1342_v42 }
 0x352   : > { %2079 = vrcp.f32 %v1283_v12  ;;  %1373 = vst.msk [vmem:[%s2314_s21 + $0xc0] sm:$0xff] %vm1348_vm9, %v1340_v58  ;;  %v1410_v14 = vsel %vm1383_vm10, 1.0, %v1340_v58  ;;  %v1431_v40 = vpack.c.bf16 %v1413_v34, %v1412_v35 }
 0x353   : > { %v2070_v44 = vpop.eup %2069  ;;  %1775 = vmatpush3.bf16.msra.mxu0 %v1421_v30  ;;  %1374 = vst.msk [vmem:[%s2314_s21 + $0xc8] sm:$0xff] %vm1348_vm9, %v1341_v29  ;;  %v1411_v4 = vsel %vm1383_vm10, 1.0, %v1341_v29 }
 0x354   : > { %v2072_v8 = vpop.eup %2071  ;;  %v1232_v15 = vpop.xlane.xlu0 %1231  ;;  %v1430_v28 = vpack.c.bf16 %v1411_v4, %v1410_v14  ;;  %v1328_v22 = vmul.f32 %v2070_v44, %v2713_v11 }
 0x355   : > { %v1235_v26 = vpop.xlane.xlu1 %1234  ;;  %2081 = vrcp.f32 %v1232_v15  ;;  %v1329_v53 = vmul.f32 %v2072_v8, %v2710_v41  ;;  %v1396_v41 = vsel %vm1383_vm10, 1.0, %v2794_v54 }
 0x356   : > { %2083 = vrcp.f32 %v1235_v26  ;;  %1776 = vmatprep.subr.bf16.mxu0 %v1430_v28  ;;  %1361 = vst.msk [vmem:[%s2314_s21 + $0x60] sm:$0xff] %vm1348_vm9, %v1328_v22  ;;  %v1423_v48 = vpack.c.bf16 %v1397_v61, %v1396_v41  ;;  %v1398_v24 = vsel %vm1383_vm10, 1.0, %v1328_v22 }
 0x357   : > { %v2074_v43 = vpop.eup %2073  ;;  %1777 = vmatpush3.bf16.msra.mxu0 %v1422_v37  ;;  %1362 = vst.msk [vmem:[%s2314_s21 + $0x68] sm:$0xff] %vm1348_vm9, %v1329_v53  ;;  %v1399_v45 = vsel %vm1383_vm10, 1.0, %v1329_v53 }
 0x358   : > { %v2076_v11 = vpop.eup %2075  ;;  %1778 = vmatprep.subr.bf16.mxu0 %v1431_v40  ;;  %v1344_v39 = vmul.f32 %v2074_v43, %v2721_v20  ;;  %v1424_v47 = vpack.c.bf16 %v1399_v45, %v1398_v24 }
 0x359   : > { %v1345_v10 = vmul.f32 %v2076_v11, %v2719_v18 }
 0x35a   : > { %1377 = vst.msk [vmem:[%s2314_s21 + $0xe0] sm:$0xff] %vm1348_vm9, %v1344_v39  ;;  %v1414_v3 = vsel %vm1383_vm10, 1.0, %v1344_v39 }
 0x35b   : > { %v2078_v5 = vpop.eup %2077  ;;  %1779 = vmatpush3.bf16.msra.mxu0 %v1423_v48  ;;  %1378 = vst.msk [vmem:[%s2314_s21 + $0xe8] sm:$0xff] %vm1348_vm9, %v1345_v10  ;;  %v1415_v20 = vsel %vm1383_vm10, 1.0, %v1345_v10 }
 0x35c   : > { %v2080_v18 = vpop.eup %2079  ;;  %v1432_v54 = vpack.c.bf16 %v1415_v20, %v1414_v3  ;;  %v1346_v32 = vmul.f32 %v2078_v5, %v2729_v51 }
 0x35d   : > { %v1347_v9 = vmul.f32 %v2080_v18, %v2727_v27 }
 0x35e   : > { %1780 = vmatprep.subr.bf16.mxu0 %v1432_v54  ;;  %1379 = vst.msk [vmem:[%s2314_s21 + $0xf0] sm:$0xff] %vm1348_vm9, %v1346_v32  ;;  %v1416_v13 = vsel %vm1383_vm10, 1.0, %v1346_v32 }
 0x35f   : > { %v2082_v21 = vpop.eup %2081  ;;  %1781 = vmatpush3.bf16.msra.mxu0 %v1424_v47  ;;  %1380 = vst.msk [vmem:[%s2314_s21 + $0xf8] sm:$0xff] %vm1348_vm9, %v1347_v9  ;;  %v1417_v62 = vsel %vm1383_vm10, 1.0, %v1347_v9 }
 0x360   : > { %v2084_v1 = vpop.eup %2083  ;;  %v1433_v51 = vpack.c.bf16 %v1417_v62, %v1416_v13  ;;  %v1330_v23 = vmul.f32 %v2082_v21, %v2737_v16  ;;  %v1460_v16 = vld [vmem:[%s2316_s17] sm:$0xff] }
 0x361   : > { %v1331_v27 = vmul.f32 %v2084_v1, %v2735_v31 }
 0x362   : > { %1782 = vmatprep.subr.bf16.mxu0 %v1433_v51  ;;  %1363 = vst.msk [vmem:[%s2314_s21 + $0x70] sm:$0xff] %vm1348_vm9, %v1330_v23  ;;  %v1400_v55 = vsel %vm1383_vm10, 1.0, %v1330_v23 }
 0x363   : > { %1364 = vst.msk [vmem:[%s2314_s21 + $0x78] sm:$0xff] %vm1348_vm9, %v1331_v27  ;;  %v1401_v57 = vsel %vm1383_vm10, 1.0, %v1331_v27 }
 0x364   : > { %v1425_v36 = vpack.c.bf16 %v1401_v57, %v1400_v55 }
 0x366   : > { %1783 = vmatpush3.bf16.msra.mxu0 %v1425_v36 }
 0x369   : > { %1725 = vmatmul.mubr.msk.bf16.vlgmr.msra.gmra.mrb[32].mxu0 %vm2750_vm8, %v2182_v46 }
 0x43c   : > { %v1784_v31 = vpop.f32.mrb[32].mxu0 }
 0x43d   : > { %v1785_v0 = vpop.f32.mrb[33].mxu0 }
 0x43e   : > { %v1786_v60 = vadd.f32 %v1785_v0, %v1784_v31  ;;  %v1787_v19 = vpop.f32.mrb[34].mxu0 }
 0x43f   : > { %v1788_v6 = vpop.f32.mrb[35].mxu0 }
 0x440   : > { %v1503_v42 = vadd.f32 %v1786_v60, %v1460_v16  ;;  %v1789_v63 = vadd.f32 %v1788_v6, %v1787_v19 }
 0x442   : > { %1505 = vst.msk [vmem:[%s2316_s17] sm:$0xff] %vm995_vm2, %v1503_v42  ;;  %v1504_v46 = vadd.f32 %v1789_v63, %v1461_v38 }
 0x444   : > { %1506 = vst.msk [vmem:[%s2316_s17 + $0x8] sm:$0xff] %vm995_vm2, %v1504_v46 }
 0x445   : > { %2098 = shalt.err (!%p2095_p8)
}
 0x446   : > { %s2099_s17 = scalar_lea.hbm %s2972_s11, 256  ;;  %s2103_s19 = scalar_lea.hbm %s3041_s7, 512 }
 0x447   : > { %p2100_p10 = scmp.ne.s32.totalorder %s2972_s11, %s2099_s17  ;;  %p2104_p13 = scmp.lt.u32.totalorder %s2972_s11, %s3041_s7 }
 0x448   : > { %p2105_p0 = scmp.lt.u32.totalorder %s2103_s19, %s2099_s17  ;;  %p2107_p2 = scmp.lt.u32.totalorder %s2099_s17, %s2972_s11 }
 0x449   : > { %p2101_p11 = pnand %p2100_p10, %p2275_p3 }
 0x44a   : > { %p2106_p1 = por %p2105_p0, %p2104_p13 }
 0x44b   : > { %p2102_p12 = pneg %p2101_p11 }
 0x44c   : > { %p2108_p4 = por %p2107_p2, %p2106_p1 }
 0x44e   : > { %p2109_p5 = pnand %p2108_p4, %p2102_p12 }
 0x450   : > { %2112 = shalt.err (!%p2109_p5)
}
 0x451   : > { %s2184_s18 = smov 128   ;;  %s2185_s21 = smov 8  }
 0x452   : > { %1862 = dma.vmem_to_hbm [thread:$0]  (%p2275_p3), %s2974_s23, 256, %s2972_s11, %s2982_s27, %s2184_s18, %s2184_s18, %s2185_s21  }
 0x453 PF: > { %p1868_p6 = scmp.ge.s32.totalorder %s2179_s8, 2  ;;  %s1559_s29 = sand.u32 1, %s2151_s24  }
 0x454   : > { %s1560_s28 = scalar_lea.sflag [#allocation3], %s1559_s29 }
 0x455   : > { %p1865_p7 = pnand %p1868_p6, %p2285_p9 }
 0x457   : > { %2146 = dma.done.wait (!%p1865_p7), %s1560_s28, 256  }
 0x458   : > { %2148 = vsyncadd (!%p1865_p7), %s1560_s28, 4294967040  ;;  %s21_s8 = sadd.s32 1, %s2179_s8   ;;  %s3056_s20 = sld [smem:[#allocation9_spill]] }
 0x459   : > { %p18_p8 = scmp.ge.s32.totalorder %s21_s8, 6   ;;  %s3057_s27 = sld [smem:[#allocation5_spill]] }
 0x45a   : > { %s3058_s28 = sld [smem:[#allocation6_spill]]  ;;  %s3059_s29 = sld [smem:[#allocation7_spill]] }
 0x45b   : > { %s3060_s30 = sld [smem:[#allocation8_spill]]  ;;  %s3061_s24 = smov %s2155_s25 }
 0x45c   : > { %s3062_s25 = smov %s2159_s26  ;;  %20 = sbr.rel (!%p18_p8) target bundleno = 5 (0x5), region = 98 }
 0x45e   : > { %s3063_s26 = smov %s3056_s20 }
 0x463   :  { %1565 = vsyncpa [#allocation3], 1 }
 0x464   :  { %1567 = vsyncpa [#allocation3 + $0x1], 1 }

</bundles_post_ra>
